<compile_context>
chip_gen: v5e
topology: v5e:2x2
jax: 0.10.0
libtpu: 0.0.40
codegen_flags: <defaults>
</compile_context>

<pallas_src>
import functools

import jax
import jax.numpy as jnp
from jax.experimental import pallas as pl
from jax.experimental.pallas import tpu as pltpu


def _light_attention_kernel(Bt, E, L, K, x_ref, w_ref, b_ref, o_ref, acc_ref):
    # x_ref:   (Bt, L + K - 1, E)  zero-padded input block, channels on lanes (bf16/f32)
    # w_ref:   (K, E, 2*E)         fused per-tap conv weights;
    #                              output cols [0,E) = feature conv, [E,2E) = attention conv
    # b_ref:   (1, 2*E)            fused conv biases (f32)
    # o_ref:   (Bt, L, E)          gated output block
    # acc_ref: (L, 2*E) f32        per-slab conv accumulator (VMEM scratch)
    for bt in range(Bt):
        # Both convolutions as K accumulating matmuls over k-shifted views of
        # the padded block.  Contraction dim is E (=128, MXU-native); total
        # MXU FLOPs identical to the single fused im2col matmul, but no 9x
        # im2col buffer and no store-bound prologue phase.
        for k in range(K):
            xk = x_ref[bt, pl.ds(k, L), :]                       # (L, E)
            contrib = jnp.dot(xk, w_ref[k],
                              preferred_element_type=jnp.float32)  # (L, 2E) f32
            if k == 0:
                acc_ref[...] = contrib
            else:
                acc_ref[...] += contrib

        res = acc_ref[...] + b_ref[...]          # (L, 2E) f32, bias added once
        feat = res[:, :E]                        # lane split at the 128 boundary
        attn = res[:, E:]

        # Softmax over the sequence (sublane) axis, per channel.
        m = jnp.max(attn, axis=0, keepdims=True)
        p = jnp.exp(attn - m)
        s = jnp.sum(p, axis=0, keepdims=True)
        inv = 1.0 / s                            # exact recip on one (1, E) row
        # Dropout(conv_dropout) is identity in eval mode.
        o_ref[bt] = (feat * (p * inv)).astype(o_ref.dtype)


def light_attention_forward(x, wf, bf, wa, ba, *, kernel_size,
                            batch_block=1, use_bf16=True):
    """LightAttention forward.

    x: [B, E, L] float32 (PyTorch NCL layout).
    wf, wa: [E, E, K] Conv1d weights (PyTorch OIH layout); bf, ba: [E] biases.
    Returns squeeze(feature_conv(x) * softmax(attention_conv(x), axis=-1)).
    """
    B, E, L = x.shape
    K = kernel_size
    # PyTorch Conv1d with padding=K//2 only preserves the length for odd K.
    assert K % 2 == 1, "even kernel_size changes the output length in PyTorch"
    assert E % 128 == 0, "channel dim must be lane-aligned (multiple of 128)"
    assert L % 8 == 0, "sequence length must be sublane-aligned (multiple of 8)"
    # TODO(synk): L not a multiple of 8 (e.g. TransferModel's per-position L=1
    # call) needs a pad+mask path or an XLA fallback.
    pad = K // 2
    Lp = L + 2 * pad
    Bt = min(batch_block, B)
    assert B % Bt == 0, "batch_block must divide the batch size"

    cdt = jnp.bfloat16 if use_bf16 else jnp.float32

    # ---- layout plumbing in plain JAX (XLA) ----
    # Channels-last so E sits on the lane axis; bf16 halves the bytes the
    # kernel has to DMA and keep double-buffered in VMEM.
    # TODO(synk): in production, produce x channels-last upstream and build the
    # K//2 halo inside the kernel instead of materializing a padded HBM copy.
    x_t = jnp.transpose(x, (0, 2, 1)).astype(cdt)                 # (B, L, E)
    x_t = jnp.pad(x_t, ((0, 0), (pad, pad), (0, 0)))              # (B, Lp, E)

    # Fused per-tap weight (K, E_in, 2*E_out): w_cat[k, ci, co] = w[co, ci, k];
    # output cols [0,E) = feature conv, [E,2E) = attention conv.
    w_cat = jnp.concatenate(
        [jnp.transpose(wf, (2, 1, 0)), jnp.transpose(wa, (2, 1, 0))],
        axis=-1).astype(cdt)                                      # (K, E, 2E)
    b_cat = jnp.concatenate([bf, ba]).reshape(1, 2 * E).astype(jnp.float32)

    kernel = functools.partial(_light_attention_kernel, Bt, E, L, K)

    out = pl.pallas_call(
        kernel,
        out_shape=jax.ShapeDtypeStruct((B, L, E), x.dtype),
        grid_spec=pltpu.PrefetchScalarGridSpec(
            num_scalar_prefetch=0,
            grid=(B // Bt,),
            in_specs=[
                pl.BlockSpec((Bt, Lp, E), lambda i: (i, 0, 0)),
                # Weight/bias are constant across the grid.
                # TODO(synk): single-buffer these via pipeline_mode=pl.Buffered(1)
                # to reclaim ~0.6 MiB of VMEM once that path is exercised.
                pl.BlockSpec((K, E, 2 * E), lambda i: (0, 0, 0)),
                pl.BlockSpec((1, 2 * E), lambda i: (0, 0)),
            ],
            out_specs=pl.BlockSpec((Bt, L, E), lambda i: (i, 0, 0)),
            scratch_shapes=[pltpu.VMEM((L, 2 * E), jnp.float32)],
        ),
        compiler_params=pltpu.CompilerParams(
            dimension_semantics=("parallel",),
            vmem_limit_bytes=48 * 1024 * 1024),
    )(x_t, w_cat, b_cat)

    # TODO(synk): for very long sequences, tile L with a K-1 halo and a
    # flash-style online softmax across L tiles (L-tile grid axis "arbitrary").
    # Back to PyTorch NCL layout, then torch.squeeze semantics (drop all 1-dims).
    return jnp.squeeze(jnp.transpose(out, (0, 2, 1)))


def _conv1d_ref(x, w, b, K):
    y = jax.lax.conv_general_dilated(
        x, w, window_strides=(1,), padding=[(K // 2, K // 2)],
        dimension_numbers=("NCH", "OIH", "NCH"))
    return y + b[None, :, None]


if __name__ == "__main__":
    # Shapes implied by TransferModel: embeddings_dim = HIDDEN_DIM = 128,
    # kernel_size = 9; small batch / sequence length for the self-test.
    B, E, L, K = 2, 128, 16, 9

    key = jax.random.PRNGKey(0)
    kx, kwf, kbf, kwa, kba = jax.random.split(key, 5)

    x = jax.random.normal(kx, (B, E, L), dtype=jnp.float32)

    # Conv1d default init: U(-1/sqrt(fan_in), 1/sqrt(fan_in)); weight [C_out, C_in, K].
    fan_in = E * K
    scale = 1.0 / (fan_in ** 0.5)
    wf = jax.random.uniform(kwf, (E, E, K), jnp.float32, -scale, scale)
    bf = jax.random.uniform(kbf, (E,), jnp.float32, -scale, scale)
    wa = jax.random.uniform(kwa, (E, E, K), jnp.float32, -scale, scale)
    ba = jax.random.uniform(kba, (E,), jnp.float32, -scale, scale)

    out = light_attention_forward(x, wf, bf, wa, ba, kernel_size=K)
    out = jax.block_until_ready(out)

    # Pure-JAX f32 reference (conv + softmax + gate).
    o_ref = _conv1d_ref(x, wf, bf, K)
    a_ref = _conv1d_ref(x, wa, ba, K)
    ref = jnp.squeeze(o_ref * jax.nn.softmax(a_ref, axis=-1))
    assert out.shape == ref.shape
    # bf16 MXU operands -> relaxed tolerance vs the f32 reference.
    assert jnp.allclose(out, ref, atol=2e-2, rtol=2e-2), "mismatch vs reference"

    print("KERNEL_OK")
</pallas_src>

<mosaic_0001>
module attributes {stable_mosaic.version = 11 : i64} {
  func.func @_light_attention_kernel(%arg0: i32, %arg1: memref<1x24x128xbf16, #tpu.memory_space<vmem>>, %arg2: memref<9x128x256xbf16, #tpu.memory_space<vmem>>, %arg3: memref<1x256xf32, #tpu.memory_space<vmem>>, %arg4: memref<1x16x128xf32, #tpu.memory_space<vmem>>, %arg5: memref<16x256xf32, #tpu.memory_space<vmem>>) attributes {dimension_semantics = [#tpu.dimension_semantics<parallel>], iteration_bounds = array<i64: 2>, scalar_prefetch = 0 : i64, scratch_operands = 1 : i64, tpu.core_type = #tpu.core_type<tc>, window_params = [{transform_indices = @transform_0, window_bounds = array<i64: 1, 24, 128>}, {pipeline_mode = #tpu.pipeline_mode<synchronous>, transform_indices = @transform_1, window_bounds = array<i64: 9, 128, 256>}, {pipeline_mode = #tpu.pipeline_mode<synchronous>, transform_indices = @transform_2, window_bounds = array<i64: 1, 256>}, {transform_indices = @transform_3, window_bounds = array<i64: 1, 16, 128>}]} {
    %c0 = arith.constant 0 : index
    %c0_0 = arith.constant 0 : index
    %c0_1 = arith.constant 0 : index
    %0 = vector.load %arg1[%c0, %c0_0, %c0_1] : memref<1x24x128xbf16, #tpu.memory_space<vmem>>, vector<1x16x128xbf16>
    %1 = vector.shape_cast %0 : vector<1x16x128xbf16> to vector<16x128xbf16>
    %c0_2 = arith.constant 0 : index
    %c0_3 = arith.constant 0 : index
    %c0_4 = arith.constant 0 : index
    %2 = vector.load %arg2[%c0_2, %c0_3, %c0_4] : memref<9x128x256xbf16, #tpu.memory_space<vmem>>, vector<1x128x256xbf16>
    %3 = vector.shape_cast %2 : vector<1x128x256xbf16> to vector<128x256xbf16>
    %cst = arith.constant dense<0.000000e+00> : vector<16x256xf32>
    %4 = tpu.matmul %1, %3, %cst {dimension_numbers = #tpu.dot_dimension_numbers<[1], [0], [0], [1], [0, 0, 1, 1], [], []>} : vector<16x128xbf16>, vector<128x256xbf16>, vector<16x256xf32> -> vector<16x256xf32>
    %c0_5 = arith.constant 0 : index
    %c0_6 = arith.constant 0 : index
    %5 = vector.load %arg5[%c0_5, %c0_6] : memref<16x256xf32, #tpu.memory_space<vmem>>, vector<16x256xf32>
    tpu.vector_store %arg5[%c0_5, %c0_6], %4 {strides = array<i32>} : memref<16x256xf32, #tpu.memory_space<vmem>>, vector<16x256xf32>,
    %c0_7 = arith.constant 0 : index
    %c1 = arith.constant 1 : index
    %c0_8 = arith.constant 0 : index
    %6 = vector.load %arg1[%c0_7, %c1, %c0_8] : memref<1x24x128xbf16, #tpu.memory_space<vmem>>, vector<1x16x128xbf16>
    %7 = vector.shape_cast %6 : vector<1x16x128xbf16> to vector<16x128xbf16>
    %c1_9 = arith.constant 1 : index
    %c0_10 = arith.constant 0 : index
    %c0_11 = arith.constant 0 : index
    %8 = vector.load %arg2[%c1_9, %c0_10, %c0_11] : memref<9x128x256xbf16, #tpu.memory_space<vmem>>, vector<1x128x256xbf16>
    %9 = vector.shape_cast %8 : vector<1x128x256xbf16> to vector<128x256xbf16>
    %cst_12 = arith.constant dense<0.000000e+00> : vector<16x256xf32>
    %10 = tpu.matmul %7, %9, %cst_12 {dimension_numbers = #tpu.dot_dimension_numbers<[1], [0], [0], [1], [0, 0, 1, 1], [], []>} : vector<16x128xbf16>, vector<128x256xbf16>, vector<16x256xf32> -> vector<16x256xf32>
    %c0_13 = arith.constant 0 : index
    %c0_14 = arith.constant 0 : index
    %11 = vector.load %arg5[%c0_13, %c0_14] : memref<16x256xf32, #tpu.memory_space<vmem>>, vector<16x256xf32>
    %12 = arith.addf %11, %10 : vector<16x256xf32>
    %c0_15 = arith.constant 0 : index
    %c0_16 = arith.constant 0 : index
    %13 = vector.load %arg5[%c0_15, %c0_16] : memref<16x256xf32, #tpu.memory_space<vmem>>, vector<16x256xf32>
    tpu.vector_store %arg5[%c0_15, %c0_16], %12 {strides = array<i32>} : memref<16x256xf32, #tpu.memory_space<vmem>>, vector<16x256xf32>,
    %c0_17 = arith.constant 0 : index
    %c2 = arith.constant 2 : index
    %c0_18 = arith.constant 0 : index
    %14 = vector.load %arg1[%c0_17, %c2, %c0_18] : memref<1x24x128xbf16, #tpu.memory_space<vmem>>, vector<1x16x128xbf16>
    %15 = vector.shape_cast %14 : vector<1x16x128xbf16> to vector<16x128xbf16>
    %c2_19 = arith.constant 2 : index
    %c0_20 = arith.constant 0 : index
    %c0_21 = arith.constant 0 : index
    %16 = vector.load %arg2[%c2_19, %c0_20, %c0_21] : memref<9x128x256xbf16, #tpu.memory_space<vmem>>, vector<1x128x256xbf16>
    %17 = vector.shape_cast %16 : vector<1x128x256xbf16> to vector<128x256xbf16>
    %cst_22 = arith.constant dense<0.000000e+00> : vector<16x256xf32>
    %18 = tpu.matmul %15, %17, %cst_22 {dimension_numbers = #tpu.dot_dimension_numbers<[1], [0], [0], [1], [0, 0, 1, 1], [], []>} : vector<16x128xbf16>, vector<128x256xbf16>, vector<16x256xf32> -> vector<16x256xf32>
    %c0_23 = arith.constant 0 : index
    %c0_24 = arith.constant 0 : index
    %19 = vector.load %arg5[%c0_23, %c0_24] : memref<16x256xf32, #tpu.memory_space<vmem>>, vector<16x256xf32>
    %20 = arith.addf %19, %18 : vector<16x256xf32>
    %c0_25 = arith.constant 0 : index
    %c0_26 = arith.constant 0 : index
    %21 = vector.load %arg5[%c0_25, %c0_26] : memref<16x256xf32, #tpu.memory_space<vmem>>, vector<16x256xf32>
    tpu.vector_store %arg5[%c0_25, %c0_26], %20 {strides = array<i32>} : memref<16x256xf32, #tpu.memory_space<vmem>>, vector<16x256xf32>,
    %c0_27 = arith.constant 0 : index
    %c3 = arith.constant 3 : index
    %c0_28 = arith.constant 0 : index
    %22 = vector.load %arg1[%c0_27, %c3, %c0_28] : memref<1x24x128xbf16, #tpu.memory_space<vmem>>, vector<1x16x128xbf16>
    %23 = vector.shape_cast %22 : vector<1x16x128xbf16> to vector<16x128xbf16>
    %c3_29 = arith.constant 3 : index
    %c0_30 = arith.constant 0 : index
    %c0_31 = arith.constant 0 : index
    %24 = vector.load %arg2[%c3_29, %c0_30, %c0_31] : memref<9x128x256xbf16, #tpu.memory_space<vmem>>, vector<1x128x256xbf16>
    %25 = vector.shape_cast %24 : vector<1x128x256xbf16> to vector<128x256xbf16>
    %cst_32 = arith.constant dense<0.000000e+00> : vector<16x256xf32>
    %26 = tpu.matmul %23, %25, %cst_32 {dimension_numbers = #tpu.dot_dimension_numbers<[1], [0], [0], [1], [0, 0, 1, 1], [], []>} : vector<16x128xbf16>, vector<128x256xbf16>, vector<16x256xf32> -> vector<16x256xf32>
    %c0_33 = arith.constant 0 : index
    %c0_34 = arith.constant 0 : index
    %27 = vector.load %arg5[%c0_33, %c0_34] : memref<16x256xf32, #tpu.memory_space<vmem>>, vector<16x256xf32>
    %28 = arith.addf %27, %26 : vector<16x256xf32>
    %c0_35 = arith.constant 0 : index
    %c0_36 = arith.constant 0 : index
    %29 = vector.load %arg5[%c0_35, %c0_36] : memref<16x256xf32, #tpu.memory_space<vmem>>, vector<16x256xf32>
    tpu.vector_store %arg5[%c0_35, %c0_36], %28 {strides = array<i32>} : memref<16x256xf32, #tpu.memory_space<vmem>>, vector<16x256xf32>,
    %c0_37 = arith.constant 0 : index
    %c4 = arith.constant 4 : index
    %c0_38 = arith.constant 0 : index
    %30 = vector.load %arg1[%c0_37, %c4, %c0_38] : memref<1x24x128xbf16, #tpu.memory_space<vmem>>, vector<1x16x128xbf16>
    %31 = vector.shape_cast %30 : vector<1x16x128xbf16> to vector<16x128xbf16>
    %c4_39 = arith.constant 4 : index
    %c0_40 = arith.constant 0 : index
    %c0_41 = arith.constant 0 : index
    %32 = vector.load %arg2[%c4_39, %c0_40, %c0_41] : memref<9x128x256xbf16, #tpu.memory_space<vmem>>, vector<1x128x256xbf16>
    %33 = vector.shape_cast %32 : vector<1x128x256xbf16> to vector<128x256xbf16>
    %cst_42 = arith.constant dense<0.000000e+00> : vector<16x256xf32>
    %34 = tpu.matmul %31, %33, %cst_42 {dimension_numbers = #tpu.dot_dimension_numbers<[1], [0], [0], [1], [0, 0, 1, 1], [], []>} : vector<16x128xbf16>, vector<128x256xbf16>, vector<16x256xf32> -> vector<16x256xf32>
    %c0_43 = arith.constant 0 : index
    %c0_44 = arith.constant 0 : index
    %35 = vector.load %arg5[%c0_43, %c0_44] : memref<16x256xf32, #tpu.memory_space<vmem>>, vector<16x256xf32>
    %36 = arith.addf %35, %34 : vector<16x256xf32>
    %c0_45 = arith.constant 0 : index
    %c0_46 = arith.constant 0 : index
    %37 = vector.load %arg5[%c0_45, %c0_46] : memref<16x256xf32, #tpu.memory_space<vmem>>, vector<16x256xf32>
    tpu.vector_store %arg5[%c0_45, %c0_46], %36 {strides = array<i32>} : memref<16x256xf32, #tpu.memory_space<vmem>>, vector<16x256xf32>,
    %c0_47 = arith.constant 0 : index
    %c5 = arith.constant 5 : index
    %c0_48 = arith.constant 0 : index
    %38 = vector.load %arg1[%c0_47, %c5, %c0_48] : memref<1x24x128xbf16, #tpu.memory_space<vmem>>, vector<1x16x128xbf16>
    %39 = vector.shape_cast %38 : vector<1x16x128xbf16> to vector<16x128xbf16>
    %c5_49 = arith.constant 5 : index
    %c0_50 = arith.constant 0 : index
    %c0_51 = arith.constant 0 : index
    %40 = vector.load %arg2[%c5_49, %c0_50, %c0_51] : memref<9x128x256xbf16, #tpu.memory_space<vmem>>, vector<1x128x256xbf16>
    %41 = vector.shape_cast %40 : vector<1x128x256xbf16> to vector<128x256xbf16>
    %cst_52 = arith.constant dense<0.000000e+00> : vector<16x256xf32>
    %42 = tpu.matmul %39, %41, %cst_52 {dimension_numbers = #tpu.dot_dimension_numbers<[1], [0], [0], [1], [0, 0, 1, 1], [], []>} : vector<16x128xbf16>, vector<128x256xbf16>, vector<16x256xf32> -> vector<16x256xf32>
    %c0_53 = arith.constant 0 : index
    %c0_54 = arith.constant 0 : index
    %43 = vector.load %arg5[%c0_53, %c0_54] : memref<16x256xf32, #tpu.memory_space<vmem>>, vector<16x256xf32>
    %44 = arith.addf %43, %42 : vector<16x256xf32>
    %c0_55 = arith.constant 0 : index
    %c0_56 = arith.constant 0 : index
    %45 = vector.load %arg5[%c0_55, %c0_56] : memref<16x256xf32, #tpu.memory_space<vmem>>, vector<16x256xf32>
    tpu.vector_store %arg5[%c0_55, %c0_56], %44 {strides = array<i32>} : memref<16x256xf32, #tpu.memory_space<vmem>>, vector<16x256xf32>,
    %c0_57 = arith.constant 0 : index
    %c6 = arith.constant 6 : index
    %c0_58 = arith.constant 0 : index
    %46 = vector.load %arg1[%c0_57, %c6, %c0_58] : memref<1x24x128xbf16, #tpu.memory_space<vmem>>, vector<1x16x128xbf16>
    %47 = vector.shape_cast %46 : vector<1x16x128xbf16> to vector<16x128xbf16>
    %c6_59 = arith.constant 6 : index
    %c0_60 = arith.constant 0 : index
    %c0_61 = arith.constant 0 : index
    %48 = vector.load %arg2[%c6_59, %c0_60, %c0_61] : memref<9x128x256xbf16, #tpu.memory_space<vmem>>, vector<1x128x256xbf16>
    %49 = vector.shape_cast %48 : vector<1x128x256xbf16> to vector<128x256xbf16>
    %cst_62 = arith.constant dense<0.000000e+00> : vector<16x256xf32>
    %50 = tpu.matmul %47, %49, %cst_62 {dimension_numbers = #tpu.dot_dimension_numbers<[1], [0], [0], [1], [0, 0, 1, 1], [], []>} : vector<16x128xbf16>, vector<128x256xbf16>, vector<16x256xf32> -> vector<16x256xf32>
    %c0_63 = arith.constant 0 : index
    %c0_64 = arith.constant 0 : index
    %51 = vector.load %arg5[%c0_63, %c0_64] : memref<16x256xf32, #tpu.memory_space<vmem>>, vector<16x256xf32>
    %52 = arith.addf %51, %50 : vector<16x256xf32>
    %c0_65 = arith.constant 0 : index
    %c0_66 = arith.constant 0 : index
    %53 = vector.load %arg5[%c0_65, %c0_66] : memref<16x256xf32, #tpu.memory_space<vmem>>, vector<16x256xf32>
    tpu.vector_store %arg5[%c0_65, %c0_66], %52 {strides = array<i32>} : memref<16x256xf32, #tpu.memory_space<vmem>>, vector<16x256xf32>,
    %c0_67 = arith.constant 0 : index
    %c7 = arith.constant 7 : index
    %c0_68 = arith.constant 0 : index
    %54 = vector.load %arg1[%c0_67, %c7, %c0_68] : memref<1x24x128xbf16, #tpu.memory_space<vmem>>, vector<1x16x128xbf16>
    %55 = vector.shape_cast %54 : vector<1x16x128xbf16> to vector<16x128xbf16>
    %c7_69 = arith.constant 7 : index
    %c0_70 = arith.constant 0 : index
    %c0_71 = arith.constant 0 : index
    %56 = vector.load %arg2[%c7_69, %c0_70, %c0_71] : memref<9x128x256xbf16, #tpu.memory_space<vmem>>, vector<1x128x256xbf16>
    %57 = vector.shape_cast %56 : vector<1x128x256xbf16> to vector<128x256xbf16>
    %cst_72 = arith.constant dense<0.000000e+00> : vector<16x256xf32>
    %58 = tpu.matmul %55, %57, %cst_72 {dimension_numbers = #tpu.dot_dimension_numbers<[1], [0], [0], [1], [0, 0, 1, 1], [], []>} : vector<16x128xbf16>, vector<128x256xbf16>, vector<16x256xf32> -> vector<16x256xf32>
    %c0_73 = arith.constant 0 : index
    %c0_74 = arith.constant 0 : index
    %59 = vector.load %arg5[%c0_73, %c0_74] : memref<16x256xf32, #tpu.memory_space<vmem>>, vector<16x256xf32>
    %60 = arith.addf %59, %58 : vector<16x256xf32>
    %c0_75 = arith.constant 0 : index
    %c0_76 = arith.constant 0 : index
    %61 = vector.load %arg5[%c0_75, %c0_76] : memref<16x256xf32, #tpu.memory_space<vmem>>, vector<16x256xf32>
    tpu.vector_store %arg5[%c0_75, %c0_76], %60 {strides = array<i32>} : memref<16x256xf32, #tpu.memory_space<vmem>>, vector<16x256xf32>,
    %c0_77 = arith.constant 0 : index
    %c8 = arith.constant 8 : index
    %c0_78 = arith.constant 0 : index
    %62 = vector.load %arg1[%c0_77, %c8, %c0_78] : memref<1x24x128xbf16, #tpu.memory_space<vmem>>, vector<1x16x128xbf16>
    %63 = vector.shape_cast %62 : vector<1x16x128xbf16> to vector<16x128xbf16>
    %c8_79 = arith.constant 8 : index
    %c0_80 = arith.constant 0 : index
    %c0_81 = arith.constant 0 : index
    %64 = vector.load %arg2[%c8_79, %c0_80, %c0_81] : memref<9x128x256xbf16, #tpu.memory_space<vmem>>, vector<1x128x256xbf16>
    %65 = vector.shape_cast %64 : vector<1x128x256xbf16> to vector<128x256xbf16>
    %cst_82 = arith.constant dense<0.000000e+00> : vector<16x256xf32>
    %66 = tpu.matmul %63, %65, %cst_82 {dimension_numbers = #tpu.dot_dimension_numbers<[1], [0], [0], [1], [0, 0, 1, 1], [], []>} : vector<16x128xbf16>, vector<128x256xbf16>, vector<16x256xf32> -> vector<16x256xf32>
    %c0_83 = arith.constant 0 : index
    %c0_84 = arith.constant 0 : index
    %67 = vector.load %arg5[%c0_83, %c0_84] : memref<16x256xf32, #tpu.memory_space<vmem>>, vector<16x256xf32>
    %68 = arith.addf %67, %66 : vector<16x256xf32>
    %c0_85 = arith.constant 0 : index
    %c0_86 = arith.constant 0 : index
    %69 = vector.load %arg5[%c0_85, %c0_86] : memref<16x256xf32, #tpu.memory_space<vmem>>, vector<16x256xf32>
    tpu.vector_store %arg5[%c0_85, %c0_86], %68 {strides = array<i32>} : memref<16x256xf32, #tpu.memory_space<vmem>>, vector<16x256xf32>,
    %c0_87 = arith.constant 0 : index
    %c0_88 = arith.constant 0 : index
    %70 = vector.load %arg5[%c0_87, %c0_88] : memref<16x256xf32, #tpu.memory_space<vmem>>, vector<16x256xf32>
    %c0_89 = arith.constant 0 : index
    %c0_90 = arith.constant 0 : index
    %71 = vector.load %arg3[%c0_89, %c0_90] : memref<1x256xf32, #tpu.memory_space<vmem>>, vector<1x256xf32>
    %72 = vector.broadcast %71 : vector<1x256xf32> to vector<16x256xf32>
    %73 = arith.addf %70, %72 : vector<16x256xf32>
    %74 = vector.extract_strided_slice %73 {offsets = [0, 0], sizes = [16, 128], strides = [1, 1]} : vector<16x256xf32> to vector<16x128xf32>
    %75 = vector.extract_strided_slice %73 {offsets = [0, 128], sizes = [16, 128], strides = [1, 1]} : vector<16x256xf32> to vector<16x128xf32>
    %cst_91 = arith.constant dense<0xFF800000> : vector<128xf32>
    %76 = vector.multi_reduction <maximumf>, %75, %cst_91 [0] : vector<16x128xf32> to vector<128xf32>
    %77 = vector.shape_cast %76 : vector<128xf32> to vector<1x128xf32>
    %78 = vector.broadcast %77 : vector<1x128xf32> to vector<16x128xf32>
    %79 = arith.subf %75, %78 : vector<16x128xf32>
    %80 = math.exp %79 : vector<16x128xf32>
    %cst_92 = arith.constant dense<0.000000e+00> : vector<128xf32>
    %81 = vector.multi_reduction <add>, %80, %cst_92 [0] : vector<16x128xf32> to vector<128xf32>
    %82 = vector.shape_cast %81 : vector<128xf32> to vector<1x128xf32>
    %cst_93 = arith.constant 1.000000e+00 : f32
    %83 = vector.broadcast %cst_93 : f32 to vector<1x128xf32>
    %84 = arith.divf %83, %82 : vector<1x128xf32>
    %85 = vector.broadcast %84 : vector<1x128xf32> to vector<16x128xf32>
    %86 = arith.mulf %80, %85 : vector<16x128xf32>
    %87 = arith.mulf %74, %86 : vector<16x128xf32>
    %c0_94 = arith.constant 0 : index
    %c0_95 = arith.constant 0 : index
    %c0_96 = arith.constant 0 : index
    %88 = vector.load %arg4[%c0_94, %c0_95, %c0_96] : memref<1x16x128xf32, #tpu.memory_space<vmem>>, vector<1x16x128xf32>
    %89 = vector.shape_cast %88 : vector<1x16x128xf32> to vector<16x128xf32>
    %90 = vector.shape_cast %87 : vector<16x128xf32> to vector<1x16x128xf32>
    tpu.vector_store %arg4[%c0_94, %c0_95, %c0_96], %90 {strides = array<i32>} : memref<1x16x128xf32, #tpu.memory_space<vmem>>, vector<1x16x128xf32>,
    return
  }
  func.func @transform_0(%arg0: i32) -> (i32, i32, i32) {
    %c0_i32 = arith.constant 0 : i32
    %c0_i32_0 = arith.constant 0 : i32
    %c0_i32_1 = arith.constant 0 : i32
    return %arg0, %c0_i32, %c0_i32_0 : i32, i32, i32
  }
  func.func @transform_1(%arg0: i32) -> (i32, i32, i32) {
    %c0_i32 = arith.constant 0 : i32
    %c0_i32_0 = arith.constant 0 : i32
    %c0_i32_1 = arith.constant 0 : i32
    %c0_i32_2 = arith.constant 0 : i32
    return %c0_i32, %c0_i32_0, %c0_i32_1 : i32, i32, i32
  }
  func.func @transform_2(%arg0: i32) -> (i32, i32) {
    %c0_i32 = arith.constant 0 : i32
    %c0_i32_0 = arith.constant 0 : i32
    %c0_i32_1 = arith.constant 0 : i32
    return %c0_i32, %c0_i32_0 : i32, i32
  }
  func.func @transform_3(%arg0: i32) -> (i32, i32, i32) {
    %c0_i32 = arith.constant 0 : i32
    %c0_i32_0 = arith.constant 0 : i32
    %c0_i32_1 = arith.constant 0 : i32
    return %arg0, %c0_i32, %c0_i32_0 : i32, i32, i32
  }
}

</mosaic_0001>

<bundles_post_ra>
// kernel: tpu_custom_call.1
= control target key start
LH: loop header
LB: loop body
LE: loop exit
PB: predicated region body
PF: predicated region fallthrough
CT: control target
= control target key end

     0   :  { %8 = vsyncpa [#allocation4], 0  ;;  %s3015_s0 = inlined_call_operand.hbm [shape: bf16[2,24,128], index: 0, kind: input, shape index: {}]   ;;  %s3016_s1 = inlined_call_operand.hbm [shape: bf16[9,128,256], index: 1, kind: input, shape index: {}]   ;;  %s3017_s2 = inlined_call_operand.hbm [shape: f32[1,256], index: 2, kind: input, shape index: {}]   ;;  %s3018_s3 = inlined_call_operand.hbm [shape: f32[2,16,128], index: 3, kind: output, shape index: {}]  }
   0x1   :  { %10 = vsyncpa [#allocation4 + $0x1], 0 }
   0x2   :  { %11 = vsyncpa [#allocation7], 0 }
   0x3   :  { %12 = vsyncpa [#allocation5], 0 }
   0x4   :  { %14 = vsyncpa [#allocation5 + $0x1], 0  ;;  %s2841_s12 = smov 0   ;;  %s2843_s13 = smov 0  }
   0x5   :  { %s2845_s14 = smov 0   ;;  %s2847_s15 = smov 0  }
   0x6 LB: > { %s2862_s16 = sadd.s32 4294967295, %s2811_s15   ;;  %s1788_s17 = sadd.s32 4294967294, %s2811_s15   ;;  %s2811_s15 = sphi %s2847_s15, %s3028_s15   ;;  %s2807_s14 = sphi %s2845_s14, %s3027_s14   ;;  %s2803_s13 = sphi %s2843_s13, %s3026_s13   ;;  %s2799_s12 = sphi %s2841_s12, %s3025_s12  }
   0x7   : > { %p40_p0 = scmp.ne.s32.totalorder %s2803_s13, %s2799_s12  ;;  %p41_p1 = scmp.eq.s32.totalorder %s2862_s16, 0 }
   0x8   : > { %p106_p2 = scmp.eq.s32.totalorder %s2862_s16, 1  ;;  %p112_p3 = scmp.eq.s32.totalorder %s1788_s17, 1 }
   0x9   : > { %p2871_p4 = por %p41_p1, %p40_p0  ;;  %p1789_p5 = scmp.ge.s32.totalorder %s2811_s15, 1 }
   0xa   : > { %p2876_p6 = por %p112_p3, %p40_p0  ;;  %p119_p7 = scmp.lt.s32.totalorder %s2811_s15, 3 }
   0xb   : > { %s130_s22 = sshll.u32 %s3016_s1, 4  ;;  %s2813_s24 = smov [#allocation6]   ;;  %s131_s22 = int_to_ptr.hbm [resolvable:$true] %s130_s22 }
   0xc   : > { %p2884_p8 = pnand %p1789_p5, %p119_p7  ;;  %s132_s25 = sshll.u32 %s2813_s24, 4  ;;  %s133_s25 = int_to_ptr.vmem [resolvable:$true] %s132_s25 }
   0xd   : > { %s145_s28 = sshll.u32 %s3017_s2, 4  ;;  %s2814_s29 = smov 128   ;;  %s146_s28 = int_to_ptr.hbm [resolvable:$true] %s145_s28 }
   0xe   : > { %p2584_p9 = pneg %p2884_p8  ;;  %s2815_s30 = smov 8  }
   0xf   : > { %s2816_s4 = smov [#allocation8]   ;;  %s2897_s6 = sadd.s32 1, %s2811_s15  }
  0x10   : > { %p2585_p10 = pnand %p2584_p9, %p41_p1  ;;  %s147_s5 = sshll.u32 %s2816_s4, 4  ;;  %s148_s5 = int_to_ptr.vmem [resolvable:$true] %s147_s5 }
  0x11   : > { %s27_s7 = sadd.s32 1, %s2807_s14  ;;  %s24_s8 = ssub.s32 %s2811_s15, %s2897_s6 }
  0x12   : > { %2587 = dma.hbm_to_vmem [thread:$0]  (!%p2585_p10), %s131_s22, 18432, %s133_s25, [#allocation7], %s2814_s29, %s2814_s29, %s2815_s30  }
  0x13   : > { %2590 = dma.hbm_to_vmem [thread:$0]  (!%p2585_p10), %s146_s28, 32, %s148_s5, [#allocation7]  }
  0x14   : > { %p34_p12 = scmp.ne.s32.totalorder %s2807_s14, %s2803_s13  ;;  %p25_p13 = scmp.eq.s32.totalorder %s24_s8, 0 }
  0x15   : > { %p35_p0 = scmp.eq.s32.totalorder %s2811_s15, 0  ;;  %p2601_p5 = scmp.lt.s32.totalorder %s2811_s15, 2 }
  0x16   : > { %p2907_p3 = por %p106_p2, %p34_p12  ;;  %s158_s11 = sand.u32 1, %s2807_s14  }
  0x17   : > { %s2913_s10 = scalar_select %p25_p13, %s2807_s14, %s27_s7  }
  0x18   : > { %p36_p7 = por %p35_p0, %p34_p12  ;;  %s2569_s17 = smul.u32 12, %s158_s11 }
  0x19   : > { %s2570_s20 = smul.u32 12, %s2811_s15  ;;  %s159_s29 = scalar_lea.sflag [#allocation4], %s158_s11 }
  0x1a   : > { %p2917_p9 = pnand %p2601_p5, %p36_p7  ;;  %s162_s26 = scalar_lea.vmem [#allocation3], %s2569_s17 }
  0x1b   : > { %s167_s25 = scalar_lea.hbm %s3015_s0, %s2570_s20  ;;  %s170_s27 = sshll.u32 %s162_s26, 4  ;;  %s171_s27 = int_to_ptr.vmem [resolvable:$true] %s170_s27 }
  0x1c   : > { %s168_s28 = sshll.u32 %s167_s25, 4  ;;  %p2715_p10 = pneg %p2917_p9  ;;  %s169_s28 = int_to_ptr.hbm [resolvable:$true] %s168_s28 }
  0x1d   : > { %s2711_s30 = sshra.s32 %s169_s28, 4  ;;  %s2718_s8 = scalar_lea.hbm %s3015_s0, 24  ;;  %s2712_s30 = int_to_ptr.hbm [resolvable:$true] %s2711_s30 }
  0x1e   : > { %s2713_s4 = scalar_lea.hbm %s2712_s30, 12  ;;  %p2719_p0 = scmp.lt.s32.totalorder %s2712_s30, %s3015_s0 }
  0x1f   : > { %p2714_p2 = scmp.ne.s32.totalorder %s2712_s30, %s2713_s4  ;;  %p2720_p5 = scmp.lt.s32.totalorder %s2718_s8, %s2713_s4 }
  0x21   : > { %p2716_p12 = pnand %p2715_p10, %p2714_p2  ;;  %p2721_p7 = por %p2720_p5, %p2719_p0 }
  0x23   : > { %p2717_p13 = pneg %p2716_p12 }
  0x25   : > { %p2722_p11 = pnand %p2721_p7, %p2717_p13 }
  0x27   : > { %2725 = shalt.err (!%p2722_p11)
}
  0x28   : > { %s2817_s11 = smov 64   ;;  %s2818_s17 = smov 4  }
  0x29   : > { %2594 = dma.hbm_to_vmem [thread:$0]  (!%p2917_p9), %s169_s28, 192, %s171_s27, %s159_s29, %s2817_s11, %s2817_s11, %s2818_s17  }
  0x2a   : > { %182 = sbr.rel (%p2884_p8) target bundleno = 417 (0x1a1), region = 32  ;;  %s2937_s24 = sand.u32 (!%p2884_p8), 1, %s2803_s13  }
  0x2b   : > { %s2571_s25 = smul.u32 (!%p2884_p8), 12, %s2937_s24  ;;  %s185_s26 = scalar_lea.sflag (!%p2884_p8), [#allocation4], %s2937_s24 }
  0x2d   : > { %s2941_s30 = scalar_lea.vmem (!%p2884_p8), [#allocation3], %s2571_s25 }
  0x2f   : > { %2786 = dma.done.wait (%p2871_p4), %s185_s26, 192  }
  0x30   : > { %2788 = vsyncadd (%p2871_p4), %s185_s26, 4294967104 }
  0x31   : > { %2790 = dma.done.wait (%p41_p1), [#allocation7], 18464  }
  0x32   : > { %2792 = vsyncadd (%p41_p1), [#allocation7], 4294948832  ;;  %v1860_v0 = vld [vmem:[#allocation6 + $0x70] sm:$0xf]  ;;  %v2431_v1 = vld [vmem:[#allocation6 + $0x74] sm:$0xf0] }
  0x33   : > { %v2430_v2 = vld [vmem:[#allocation6 + $0x74] sm:$0xf]  ;;  %v1861_v3 = vor.u32 %v2431_v1, %v1860_v0  ;;  %v1862_v4 = vld [vmem:[#allocation6 + $0x78] sm:$0xf0]  ;;  %v1928_v5 = vld [vmem:[#allocation6 + $0xf0] sm:$0xf] }
  0x34   : > { %v2448_v6 = vld [vmem:[#allocation6 + $0xf4] sm:$0xf0]  ;;  %v1865_v7 = vor.u32 %v2430_v2, %v1862_v4  ;;  %v2447_v9 = vld [vmem:[#allocation6 + $0xf4] sm:$0xf]  ;;  %v1930_v10 = vld [vmem:[#allocation6 + $0xf8] sm:$0xf0] }
  0x35   : > { %v1929_v8 = vor.u32 %v2448_v6, %v1928_v5  ;;  %v1852_v11 = vld [vmem:[#allocation6 + $0x60] sm:$0xf]  ;;  %326 = vmatpush.bf16.msra.mxu0 %v1861_v3  ;;  %v1933_v12 = vor.u32 %v2447_v9, %v1930_v10  ;;  %v2429_v13 = vld [vmem:[#allocation6 + $0x64] sm:$0xf0]  ;;  %v2428_v14 = vld [vmem:[#allocation6 + $0x64] sm:$0xf] }
  0x36   : > { %v1854_v15 = vld [vmem:[#allocation6 + $0x68] sm:$0xf0]  ;;  %340 = vmatpush.bf16.msra.mxu1 %v1865_v7  ;;  %v1853_v16 = vor.u32 %v2429_v13, %v1852_v11  ;;  %v1920_v18 = vld [vmem:[#allocation6 + $0xe0] sm:$0xf]  ;;  %v2446_v19 = vld [vmem:[#allocation6 + $0xe4] sm:$0xf0] }
  0x37   : > { %480 = vmatpush.bf16.msra.mxu2 %v1929_v8  ;;  %v1857_v17 = vor.u32 %v2428_v14, %v1854_v15  ;;  %v2445_v20 = vld [vmem:[#allocation6 + $0xe4] sm:$0xf]  ;;  %494 = vmatpush.bf16.msra.mxu3 %v1933_v12  ;;  %v1921_v21 = vor.u32 %v2446_v19, %v1920_v18  ;;  %v1922_v22 = vld [vmem:[#allocation6 + $0xe8] sm:$0xf0]  ;;  %v1844_v23 = vld [vmem:[#allocation6 + $0x50] sm:$0xf] }
  0x38   : > { %v2427_v24 = vld [vmem:[#allocation6 + $0x54] sm:$0xf0]  ;;  %v1925_v25 = vor.u32 %v2445_v20, %v1922_v22  ;;  %v2426_v26 = vld [vmem:[#allocation6 + $0x54] sm:$0xf]  ;;  %v1846_v27 = vld [vmem:[#allocation6 + $0x58] sm:$0xf0] }
  0x39   : > { %v1912_v28 = vld [vmem:[#allocation6 + $0xd0] sm:$0xf]  ;;  %327 = vmatpush.bf16.msra.mxu0 %v1853_v16  ;;  %v1845_v29 = vor.u32 %v2427_v24, %v1844_v23  ;;  %v2444_v30 = vld [vmem:[#allocation6 + $0xd4] sm:$0xf0]  ;;  %v2443_v31 = vld [vmem:[#allocation6 + $0xd4] sm:$0xf]  ;;  %v1849_v33 = vor.u32 %v2426_v26, %v1846_v27 }
  0x3a   : > { %v1914_v32 = vld [vmem:[#allocation6 + $0xd8] sm:$0xf0]  ;;  %341 = vmatpush.bf16.msra.mxu1 %v1857_v17  ;;  %v1913_v34 = vor.u32 %v2444_v30, %v1912_v28  ;;  %v1836_v35 = vld [vmem:[#allocation6 + $0x40] sm:$0xf]  ;;  %v2425_v36 = vld [vmem:[#allocation6 + $0x44] sm:$0xf0] }
  0x3b   : > { %481 = vmatpush.bf16.msra.mxu2 %v1921_v21  ;;  %v2424_v37 = vld [vmem:[#allocation6 + $0x44] sm:$0xf]  ;;  %495 = vmatpush.bf16.msra.mxu3 %v1925_v25  ;;  %v1917_v38 = vor.u32 %v2443_v31, %v1914_v32  ;;  %v1838_v39 = vld [vmem:[#allocation6 + $0x48] sm:$0xf0]  ;;  %v1904_v40 = vld [vmem:[#allocation6 + $0xc0] sm:$0xf]  ;;  %v1837_v44 = vor.u32 %v2425_v36, %v1836_v35 }
  0x3c   : > { %v2442_v41 = vld [vmem:[#allocation6 + $0xc4] sm:$0xf0]  ;;  %v2441_v42 = vld [vmem:[#allocation6 + $0xc4] sm:$0xf]  ;;  %v1906_v43 = vld [vmem:[#allocation6 + $0xc8] sm:$0xf0]  ;;  %v1841_v45 = vor.u32 %v2424_v37, %v1838_v39 }
  0x3d   : > { %328 = vmatpush.bf16.msra.mxu0 %v1845_v29  ;;  %v1905_v46 = vor.u32 %v2442_v41, %v1904_v40  ;;  %v1828_v47 = vld [vmem:[#allocation6 + $0x30] sm:$0xf]  ;;  %v2423_v48 = vld [vmem:[#allocation6 + $0x34] sm:$0xf0]  ;;  %v2422_v49 = vld [vmem:[#allocation6 + $0x34] sm:$0xf]  ;;  %v1909_v50 = vor.u32 %v2441_v42, %v1906_v43 }
  0x3e   : > { %342 = vmatpush.bf16.msra.mxu1 %v1849_v33  ;;  %v1830_v51 = vld [vmem:[#allocation6 + $0x38] sm:$0xf0]  ;;  %v1896_v52 = vld [vmem:[#allocation6 + $0xb0] sm:$0xf]  ;;  %v2440_v53 = vld [vmem:[#allocation6 + $0xb4] sm:$0xf0]  ;;  %v1829_v56 = vor.u32 %v2423_v48, %v1828_v47 }
  0x3f   : > { %482 = vmatpush.bf16.msra.mxu2 %v1913_v34  ;;  %496 = vmatpush.bf16.msra.mxu3 %v1917_v38  ;;  %v2439_v54 = vld [vmem:[#allocation6 + $0xb4] sm:$0xf]  ;;  %v1898_v55 = vld [vmem:[#allocation6 + $0xb8] sm:$0xf0]  ;;  %v1833_v57 = vor.u32 %v2422_v49, %v1830_v51  ;;  %v1897_v58 = vor.u32 %v2440_v53, %v1896_v52  ;;  %v1820_v59 = vld [vmem:[#allocation6 + $0x20] sm:$0xf] }
  0x40   : > { %v2421_v60 = vld [vmem:[#allocation6 + $0x24] sm:$0xf0]  ;;  %v2420_v61 = vld [vmem:[#allocation6 + $0x24] sm:$0xf]  ;;  %v1901_v62 = vor.u32 %v2439_v54, %v1898_v55  ;;  %v1822_v63 = vld [vmem:[#allocation6 + $0x28] sm:$0xf0] }
  0x41   : > { %329 = vmatpush.bf16.msra.mxu0 %v1837_v44  ;;  %v1888_v0 = vld [vmem:[#allocation6 + $0xa0] sm:$0xf]  ;;  %v2438_v1 = vld [vmem:[#allocation6 + $0xa4] sm:$0xf0]  ;;  %v2437_v2 = vld [vmem:[#allocation6 + $0xa4] sm:$0xf]  ;;  %v1821_v4 = vor.u32 %v2421_v60, %v1820_v59  ;;  %v1825_v5 = vor.u32 %v2420_v61, %v1822_v63 }
  0x42   : > { %343 = vmatpush.bf16.msra.mxu1 %v1841_v45  ;;  %v1890_v3 = vld [vmem:[#allocation6 + $0xa8] sm:$0xf0]  ;;  %v1889_v6 = vor.u32 %v2438_v1, %v1888_v0  ;;  %v1812_v7 = vld [vmem:[#allocation6 + $0x10] sm:$0xf]  ;;  %v2419_v8 = vld [vmem:[#allocation6 + $0x14] sm:$0xf0] }
  0x43   : > { %483 = vmatpush.bf16.msra.mxu2 %v1905_v46  ;;  %497 = vmatpush.bf16.msra.mxu3 %v1909_v50  ;;  %v2418_v9 = vld [vmem:[#allocation6 + $0x14] sm:$0xf]  ;;  %v1893_v10 = vor.u32 %v2437_v2, %v1890_v3  ;;  %v1814_v11 = vld [vmem:[#allocation6 + $0x18] sm:$0xf0]  ;;  %v1880_v12 = vld [vmem:[#allocation6 + $0x90] sm:$0xf]  ;;  %v1813_v16 = vor.u32 %v2419_v8, %v1812_v7 }
  0x44   : > { %v2436_v13 = vld [vmem:[#allocation6 + $0x94] sm:$0xf0]  ;;  %v2435_v14 = vld [vmem:[#allocation6 + $0x94] sm:$0xf]  ;;  %v1882_v15 = vld [vmem:[#allocation6 + $0x98] sm:$0xf0]  ;;  %v1817_v19 = vor.u32 %v2418_v9, %v1814_v11 }
  0x45   : > { %330 = vmatpush.bf16.msra.mxu0 %v1829_v56  ;;  %v1804_v17 = vld [vmem:[#allocation6] sm:$0xf]  ;;  %v2417_v18 = vld [vmem:[#allocation6 + $0x4] sm:$0xf0]  ;;  %v1881_v20 = vor.u32 %v2436_v13, %v1880_v12  ;;  %v2416_v21 = vld [vmem:[#allocation6 + $0x4] sm:$0xf]  ;;  %v1885_v24 = vor.u32 %v2435_v14, %v1882_v15 }
  0x46   : > { %344 = vmatpush.bf16.msra.mxu1 %v1833_v57  ;;  %v1806_v22 = vld [vmem:[#allocation6 + $0x8] sm:$0xf0]  ;;  %v1872_v23 = vld [vmem:[#allocation6 + $0x80] sm:$0xf]  ;;  %v2434_v25 = vld [vmem:[#allocation6 + $0x84] sm:$0xf0]  ;;  %v1805_v31 = vor.u32 %v2417_v18, %v1804_v17 }
  0x47   : > { %484 = vmatpush.bf16.msra.mxu2 %v1897_v58  ;;  %498 = vmatpush.bf16.msra.mxu3 %v1901_v62  ;;  %v2433_v26 = vld [vmem:[#allocation6 + $0x84] sm:$0xf]  ;;  %v1874_v27 = vld [vmem:[#allocation6 + $0x88] sm:$0xf0]  ;;  %v1996_v28 = vld [vmem:[#allocation6 + $0x170] sm:$0xf]  ;;  %v1809_v35 = vor.u32 %v2416_v21, %v1806_v22  ;;  %v1873_v36 = vor.u32 %v2434_v25, %v1872_v23 }
  0x48   : > { %v2465_v29 = vld [vmem:[#allocation6 + $0x174] sm:$0xf0]  ;;  %v2464_v30 = vld [vmem:[#allocation6 + $0x174] sm:$0xf]  ;;  %v1998_v32 = vld [vmem:[#allocation6 + $0x178] sm:$0xf0]  ;;  %v1877_v39 = vor.u32 %v2433_v26, %v1874_v27 }
  0x49   : > { %331 = vmatpush.bf16.msra.mxu0 %v1821_v4  ;;  %v2064_v33 = vld [vmem:[#allocation6 + $0x1f0] sm:$0xf]  ;;  %v2482_v34 = vld [vmem:[#allocation6 + $0x1f4] sm:$0xf0]  ;;  %v2481_v37 = vld [vmem:[#allocation6 + $0x1f4] sm:$0xf]  ;;  %v1997_v40 = vor.u32 %v2465_v29, %v1996_v28  ;;  %v2001_v43 = vor.u32 %v2464_v30, %v1998_v32 }
  0x4a   : > { %345 = vmatpush.bf16.msra.mxu1 %v1825_v5  ;;  %v2066_v38 = vld [vmem:[#allocation6 + $0x1f8] sm:$0xf0]  ;;  %v1988_v41 = vld [vmem:[#allocation6 + $0x160] sm:$0xf]  ;;  %v2463_v42 = vld [vmem:[#allocation6 + $0x164] sm:$0xf0]  ;;  %v2065_v44 = vor.u32 %v2482_v34, %v2064_v33 }
  0x4b   : > { %485 = vmatpush.bf16.msra.mxu2 %v1889_v6  ;;  %499 = vmatpush.bf16.msra.mxu3 %v1893_v10  ;;  %v2462_v45 = vld [vmem:[#allocation6 + $0x164] sm:$0xf]  ;;  %v1990_v46 = vld [vmem:[#allocation6 + $0x168] sm:$0xf0]  ;;  %v2056_v47 = vld [vmem:[#allocation6 + $0x1e0] sm:$0xf]  ;;  %v2069_v48 = vor.u32 %v2481_v37, %v2066_v38  ;;  %v1989_v55 = vor.u32 %v2463_v42, %v1988_v41 }
  0x4c   : > { %v2480_v49 = vld [vmem:[#allocation6 + $0x1e4] sm:$0xf0]  ;;  %v2479_v50 = vld [vmem:[#allocation6 + $0x1e4] sm:$0xf]  ;;  %v2058_v51 = vld [vmem:[#allocation6 + $0x1e8] sm:$0xf0]  ;;  %v1993_v58 = vor.u32 %v2462_v45, %v1990_v46 }
  0x4d   : > { %332 = vmatpush.bf16.msra.mxu0 %v1813_v16  ;;  %v2415_v52 = vld [vmem:[%s2941_s30] sm:$0xff]  ;;  %v360_v54 = vld [vmem:[%s2941_s30 + $0x8] sm:$0x1]  ;;  %v2057_v59 = vor.u32 %v2480_v49, %v2056_v47  ;;  %v2061_v0 = vor.u32 %v2479_v50, %v2058_v51  ;;  %v1972_v9 = vld [vmem:[#allocation6 + $0x140] sm:$0xf]  ;;  %vm548_vm1 = vcmask 1046528  }
  0x4e   : > { %346 = vmatpush.bf16.msra.mxu1 %v1817_v19  ;;  %v2432_v53 = vld [vmem:[%s2941_s30] sm:$0xff]  ;;  %v1980_v56 = vld [vmem:[#allocation6 + $0x150] sm:$0xf]  ;;  %v383_v57 = vunpack.c.l.b16 %v360_v54  ;;  %v1982_v1 = vld [vmem:[#allocation6 + $0x158] sm:$0xf0]  ;;  %vm868_vm3 = vcmask 1045504  }
  0x4f   : > { %486 = vmatpush.bf16.msra.mxu2 %v1881_v20  ;;  %500 = vmatpush.bf16.msra.mxu3 %v1885_v24  ;;  %v2461_v60 = vld [vmem:[#allocation6 + $0x154] sm:$0xf0]  ;;  %v2460_v61 = vld [vmem:[#allocation6 + $0x154] sm:$0xf]  ;;  %v388_v62 = vshrl.u32 %v2432_v53, 16  ;;  %v390_v63 = vshll.u32 %v2432_v53, 16 }
  0x50   : > { %v2048_v2 = vld [vmem:[#allocation6 + $0x1d0] sm:$0xf]  ;;  %v2478_v3 = vld [vmem:[#allocation6 + $0x1d4] sm:$0xf0]  ;;  %v385_v4 = vpack.c.b16 %v383_v57, %v383_v57  ;;  %v2477_v5 = vld [vmem:[#allocation6 + $0x1d4] sm:$0xf]  ;;  %v1981_v8 = vor.u32 %v2461_v60, %v1980_v56  ;;  %v1985_v12 = vor.u32 %v2460_v61, %v1982_v1 }
  0x51   : > { %333 = vmatpush.bf16.msra.mxu0 %v1805_v31  ;;  %v2050_v6 = vld [vmem:[#allocation6 + $0x1d8] sm:$0xf0]  ;;  %v392_v7 = vrot.slane %v390_v63, 1  ;;  %v2459_v10 = vld [vmem:[#allocation6 + $0x144] sm:$0xf0]  ;;  %v2049_v13 = vor.u32 %v2478_v3, %v2048_v2  ;;  %vm1188_vm5 = vcmask 1044480  }
  0x52   : > { %347 = vmatpush.bf16.msra.mxu1 %v1809_v35  ;;  %v395_v11 = vshll.u32 %v385_v4, 16  ;;  %v2458_v14 = vld [vmem:[#allocation6 + $0x144] sm:$0xf]  ;;  %v1974_v15 = vld [vmem:[#allocation6 + $0x148] sm:$0xf0]  ;;  %v2053_v17 = vor.u32 %v2477_v5, %v2050_v6  ;;  %v1973_v23 = vor.u32 %v2459_v10, %v1972_v9  ;;  %s1797_s18 = sshll.u32 %s2937_s24, 4 }
  0x53   : > { %487 = vmatpush.bf16.msra.mxu2 %v1873_v36  ;;  %501 = vmatpush.bf16.msra.mxu3 %v1877_v39  ;;  %vm386_vm0 = vsmask.f32 7424  ;;  %v393_v16 = vor.u32 %v392_v7, %v388_v62  ;;  %v2040_v18 = vld [vmem:[#allocation6 + $0x1c0] sm:$0xf]  ;;  %v2476_v19 = vld [vmem:[#allocation6 + $0x1c4] sm:$0xf0]  ;;  %v1977_v25 = vor.u32 %v2458_v14, %v1974_v15 }
  0x54   : > { %334 = vmatmul.bf16.vlgmr.msra.gmra.mxu0 %v2415_v52  ;;  %v397_v20 = vrot.slane %v395_v11, 1  ;;  %v2475_v21 = vld [vmem:[#allocation6 + $0x1c4] sm:$0xf]  ;;  %v2042_v22 = vld [vmem:[#allocation6 + $0x1c8] sm:$0xf0]  ;;  %v2041_v26 = vor.u32 %v2476_v19, %v2040_v18  ;;  %s2568_s23 = sshll.u32 %s2862_s16, 4 }
  0x55   : > { %633 = vmatpush.bf16.msrb.mxu0 %v1997_v40  ;;  %348 = vmatmul.bf16.vlgmr.msra.gmra.mxu1 %v2415_v52  ;;  %v1964_v27 = vld [vmem:[#allocation6 + $0x130] sm:$0xf]  ;;  %v2457_v28 = vld [vmem:[#allocation6 + $0x134] sm:$0xf0]  ;;  %v2456_v29 = vld [vmem:[#allocation6 + $0x134] sm:$0xf]  ;;  %v2045_v30 = vor.u32 %v2475_v21, %v2042_v22  ;;  %s1692_s28 = scalar_lea.hbm %s3018_s3, %s2568_s23 }
  0x56   : > { %647 = vmatpush.bf16.msrb.mxu1 %v2001_v43  ;;  %v398_v24 = vsel %vm386_vm0, %v393_v16, %v397_v20  ;;  %v1966_v31 = vld [vmem:[#allocation6 + $0x138] sm:$0xf0]  ;;  %v2032_v32 = vld [vmem:[#allocation6 + $0x1b0] sm:$0xf]  ;;  %v2474_v33 = vld [vmem:[#allocation6 + $0x1b4] sm:$0xf0]  ;;  %v1965_v36 = vor.u32 %v2457_v28, %v1964_v27 }
  0x57   : > { %800 = vmatpush.bf16.msrb.mxu2 %v2065_v44  ;;  %814 = vmatpush.bf16.msrb.mxu3 %v2069_v48  ;;  %v2473_v34 = vld [vmem:[#allocation6 + $0x1b4] sm:$0xf]  ;;  %v2034_v35 = vld [vmem:[#allocation6 + $0x1b8] sm:$0xf0]  ;;  %v1956_v37 = vld [vmem:[#allocation6 + $0x120] sm:$0xf]  ;;  %v1969_v39 = vor.u32 %v2456_v29, %v1966_v31  ;;  %v2033_v40 = vor.u32 %v2474_v33, %v2032_v32 }
  0x58   : > { %488 = vmatmul.bf16.vlgmr.msra.gmra.mxu2 %v398_v24  ;;  %502 = vmatmul.bf16.vlgmr.msra.gmra.mxu3 %v398_v24  ;;  %v2455_v38 = vld [vmem:[#allocation6 + $0x124] sm:$0xf0]  ;;  %v2454_v41 = vld [vmem:[#allocation6 + $0x124] sm:$0xf]  ;;  %v1958_v42 = vld [vmem:[#allocation6 + $0x128] sm:$0xf0]  ;;  %v2037_v44 = vor.u32 %v2473_v34, %v2034_v35 }
  0x59   : > { %634 = vmatpush.bf16.msrb.mxu0 %v1989_v55  ;;  %v2024_v43 = vld [vmem:[#allocation6 + $0x1a0] sm:$0xf]  ;;  %v2472_v45 = vld [vmem:[#allocation6 + $0x1a4] sm:$0xf0]  ;;  %v2471_v46 = vld [vmem:[#allocation6 + $0x1a4] sm:$0xf]  ;;  %v1957_v53 = vor.u32 %v2455_v38, %v1956_v37  ;;  %v1961_v54 = vor.u32 %v2454_v41, %v1958_v42 }
  0x5a   : > { %648 = vmatpush.bf16.msrb.mxu1 %v1993_v58  ;;  %v2026_v47 = vld [vmem:[#allocation6 + $0x1a8] sm:$0xf0]  ;;  %v1948_v48 = vld [vmem:[#allocation6 + $0x110] sm:$0xf]  ;;  %v2453_v49 = vld [vmem:[#allocation6 + $0x114] sm:$0xf0]  ;;  %v2025_v58 = vor.u32 %v2472_v45, %v2024_v43 }
  0x5b   : > { %801 = vmatpush.bf16.msrb.mxu2 %v2057_v59  ;;  %815 = vmatpush.bf16.msrb.mxu3 %v2061_v0  ;;  %v2452_v50 = vld [vmem:[#allocation6 + $0x114] sm:$0xf]  ;;  %v522_v51 = vld [vmem:[%s2941_s30 + $0x8] sm:$0x1]  ;;  %v2466_v56 = vld [vmem:[%s2941_s30] sm:$0xf0]  ;;  %v2029_v1 = vor.u32 %v2471_v46, %v2026_v47  ;;  %v1949_v10 = vor.u32 %v2453_v49, %v1948_v48 }
  0x5c   : > { %v2004_v52 = vld [vmem:[%s2941_s30] sm:$0xe]  ;;  %v1950_v55 = vld [vmem:[#allocation6 + $0x118] sm:$0xf0]  ;;  %v2016_v59 = vld [vmem:[#allocation6 + $0x190] sm:$0xf]  ;;  %v545_v62 = vunpack.c.l.b16 %v522_v51 }
  0x5d   : > { %635 = vmatpush.bf16.msrb.mxu0 %v1981_v8  ;;  %v675_v57 = vld [vmem:[%s2941_s30 + $0x8] sm:$0x3]  ;;  %v2470_v60 = vld [vmem:[#allocation6 + $0x194] sm:$0xf0]  ;;  %v2469_v61 = vld [vmem:[#allocation6 + $0x194] sm:$0xf]  ;;  %v2005_v0 = vor.u32 %v2466_v56, %v2004_v52  ;;  %v1953_v11 = vor.u32 %v2452_v50, %v1950_v55 }
  0x5e   : > { %649 = vmatpush.bf16.msrb.mxu1 %v1985_v12  ;;  %v698_v63 = vunpack.c.l.b16 %v675_v57  ;;  %v2018_v2 = vld [vmem:[#allocation6 + $0x198] sm:$0xf0]  ;;  %v1936_v3 = vld [vmem:[%s2941_s30] sm:$0xe]  ;;  %v2449_v4 = vld [vmem:[%s2941_s30] sm:$0xf0]  ;;  %v2017_v12 = vor.u32 %v2470_v60, %v2016_v59  ;;  %v547_v19 = vpack.c.b16 %v545_v62, %v545_v62 }
  0x5f   : > { %802 = vmatpush.bf16.msrb.mxu2 %v2049_v13  ;;  %816 = vmatpush.bf16.msrb.mxu3 %v2053_v17  ;;  %v1940_v5 = vld [vmem:[#allocation6 + $0x100] sm:$0xf]  ;;  %v2451_v6 = vld [vmem:[#allocation6 + $0x104] sm:$0xf0]  ;;  %v703_v8 = vshrl.u32 %v2005_v0, 16  ;;  %v706_v9 = vshll.u32 %v2005_v0, 16  ;;  %v1937_v18 = vor.u32 %v2449_v4, %v1936_v3  ;;  %v2021_v22 = vor.u32 %v2469_v61, %v2018_v2 }
  0x60   : > { %v700_v7 = vpack.c.b16 %v698_v63, %v698_v63  ;;  %v2450_v13 = vld [vmem:[#allocation6 + $0x104] sm:$0xf]  ;;  %v1942_v14 = vld [vmem:[#allocation6 + $0x108] sm:$0xf0]  ;;  %v2008_v15 = vld [vmem:[#allocation6 + $0x180] sm:$0xf]  ;;  %v1941_v31 = vor.u32 %v2451_v6, %v1940_v5 }
  0x61   : > { %636 = vmatpush.bf16.msrb.mxu0 %v1973_v23  ;;  %v2468_v16 = vld [vmem:[#allocation6 + $0x184] sm:$0xf0]  ;;  %v2467_v17 = vld [vmem:[#allocation6 + $0x184] sm:$0xf]  ;;  %v2010_v23 = vld [vmem:[#allocation6 + $0x188] sm:$0xf0]  ;;  %v1945_v32 = vor.u32 %v2450_v13, %v1942_v14 }
  0x62   : > { %650 = vmatpush.bf16.msrb.mxu1 %v1977_v25  ;;  %v711_v20 = vshrl.u32 %v700_v7, 16  ;;  %v714_v21 = vshll.u32 %v700_v7, 16  ;;  %v2132_v24 = vld [vmem:[#allocation6 + $0x270] sm:$0xf]  ;;  %v705_v25 = vrot.slane %v703_v8, 1  ;;  %v2013_v37 = vor.u32 %v2467_v17, %v2010_v23  ;;  %s221_s16 = scalar_lea.vmem [#allocation9], %s1797_s18 }
  0x63   : > { %803 = vmatpush.bf16.msrb.mxu2 %v2041_v26  ;;  %817 = vmatpush.bf16.msrb.mxu3 %v2045_v30  ;;  %v708_v26 = vrot.slane %v706_v9, 2  ;;  %v2499_v27 = vld [vmem:[#allocation6 + $0x274] sm:$0xf0]  ;;  %v2498_v28 = vld [vmem:[#allocation6 + $0x274] sm:$0xf]  ;;  %v550_v41 = vrot.slane %v547_v19, 1 }
  0x64   : > { %v713_v29 = vrot.slane %v711_v20, 1  ;;  %v716_v30 = vrot.slane %v714_v21, 2  ;;  %v2134_v33 = vld [vmem:[#allocation6 + $0x278] sm:$0xf0]  ;;  %v2200_v34 = vld [vmem:[#allocation6 + $0x2f0] sm:$0xf]  ;;  %v2133_v42 = vor.u32 %v2499_v27, %v2132_v24 }
  0x65   : > { %637 = vmatpush.bf16.msrb.mxu0 %v1965_v36  ;;  %v2516_v35 = vld [vmem:[#allocation6 + $0x2f4] sm:$0xf0]  ;;  %v2009_v36 = vor.u32 %v2468_v16, %v2008_v15  ;;  %v2515_v38 = vld [vmem:[#allocation6 + $0x2f4] sm:$0xf]  ;;  %vm701_vm2 = vsmask.f32 6400  ;;  %v709_v43 = vor.u32 %v708_v26, %v705_v25  ;;  %v2137_v45 = vor.u32 %v2498_v28, %v2134_v33 }
  0x66   : > { %651 = vmatpush.bf16.msrb.mxu1 %v1969_v39  ;;  %v2202_v39 = vld [vmem:[#allocation6 + $0x2f8] sm:$0xf0]  ;;  %v2201_v46 = vor.u32 %v2516_v35, %v2200_v34  ;;  %v2124_v47 = vld [vmem:[#allocation6 + $0x260] sm:$0xf]  ;;  %v2497_v48 = vld [vmem:[#allocation6 + $0x264] sm:$0xf0] }
  0x67   : > { %804 = vmatpush.bf16.msrb.mxu2 %v2033_v40  ;;  %818 = vmatpush.bf16.msrb.mxu3 %v2037_v44  ;;  %v549_v40 = vrot.slane %v1937_v18, 1  ;;  %v717_v44 = vor.u32 %v716_v30, %v713_v29  ;;  %v2496_v49 = vld [vmem:[#allocation6 + $0x264] sm:$0xf]  ;;  %v2205_v50 = vor.u32 %v2515_v38, %v2202_v39  ;;  %v2126_v51 = vld [vmem:[#allocation6 + $0x268] sm:$0xf0]  ;;  %s1693_s29 = sshll.u32 %s221_s16, 4  ;;  %s1694_s29 = int_to_ptr.vmem [resolvable:$true] %s1693_s29 }
  0x68   : > { %v2192_v52 = vld [vmem:[#allocation6 + $0x2e0] sm:$0xf]  ;;  %v2513_v55 = vld [vmem:[#allocation6 + $0x2e4] sm:$0xf]  ;;  %v2194_v56 = vld [vmem:[#allocation6 + $0x2e8] sm:$0xf0]  ;;  %v2129_v59 = vor.u32 %v2496_v49, %v2126_v51 }
  0x69   : > { %638 = vmatpush.bf16.msrb.mxu0 %v1957_v53  ;;  %v2514_v53 = vld [vmem:[#allocation6 + $0x2e4] sm:$0xf0]  ;;  %v718_v57 = vsel %vm701_vm2, %v709_v43, %v717_v44  ;;  %v2116_v61 = vld [vmem:[#allocation6 + $0x250] sm:$0xf]  ;;  %v2495_v62 = vld [vmem:[#allocation6 + $0x254] sm:$0xf0]  ;;  %v2197_v0 = vor.u32 %v2513_v55, %v2194_v56 }
  0x6a   : > { %652 = vmatpush.bf16.msrb.mxu1 %v1961_v54  ;;  %v551_v54 = vsel %vm548_vm1, %v549_v40, %v550_v41  ;;  %v2193_v60 = vor.u32 %v2514_v53, %v2192_v52  ;;  %v2494_v63 = vld [vmem:[#allocation6 + $0x254] sm:$0xf]  ;;  %v2184_v2 = vld [vmem:[#allocation6 + $0x2d0] sm:$0xf]  ;;  %v2512_v3 = vld [vmem:[#allocation6 + $0x2d4] sm:$0xf0]  ;;  %v2117_v6 = vor.u32 %v2495_v62, %v2116_v61 }
  0x6b   : > { %805 = vmatpush.bf16.msrb.mxu2 %v2025_v58  ;;  %819 = vmatpush.bf16.msrb.mxu3 %v2029_v1  ;;  %v2125_v58 = vor.u32 %v2497_v48, %v2124_v47  ;;  %v2118_v1 = vld [vmem:[#allocation6 + $0x258] sm:$0xf0]  ;;  %v2511_v4 = vld [vmem:[#allocation6 + $0x2d4] sm:$0xf]  ;;  %v2185_v8 = vor.u32 %v2512_v3, %v2184_v2  ;;  %v2108_v9 = vld [vmem:[#allocation6 + $0x240] sm:$0xf] }
  0x6c   : > { %v2186_v5 = vld [vmem:[#allocation6 + $0x2d8] sm:$0xf0]  ;;  %v2121_v7 = vor.u32 %v2494_v63, %v2118_v1  ;;  %v2110_v13 = vld [vmem:[#allocation6 + $0x248] sm:$0xf0]  ;;  %v2176_v14 = vld [vmem:[#allocation6 + $0x2c0] sm:$0xf] }
  0x6d   : > { %639 = vmatpush.bf16.msrb.mxu0 %v1949_v10  ;;  %v2493_v10 = vld [vmem:[#allocation6 + $0x244] sm:$0xf0]  ;;  %v2509_v16 = vld [vmem:[#allocation6 + $0x2c4] sm:$0xf]  ;;  %v2178_v17 = vld [vmem:[#allocation6 + $0x2c8] sm:$0xf0] }
  0x6e   : > { %653 = vmatpush.bf16.msrb.mxu1 %v1953_v11  ;;  %v2492_v11 = vld [vmem:[#allocation6 + $0x244] sm:$0xf]  ;;  %v2510_v15 = vld [vmem:[#allocation6 + $0x2c4] sm:$0xf0]  ;;  %v2109_v18 = vor.u32 %v2493_v10, %v2108_v9  ;;  %v2100_v19 = vld [vmem:[#allocation6 + $0x230] sm:$0xf]  ;;  %v2181_v26 = vor.u32 %v2509_v16, %v2178_v17 }
  0x6f   : > { %806 = vmatpush.bf16.msrb.mxu2 %v2017_v12  ;;  %820 = vmatpush.bf16.msrb.mxu3 %v2021_v22  ;;  %v2189_v12 = vor.u32 %v2511_v4, %v2186_v5  ;;  %v2491_v20 = vld [vmem:[#allocation6 + $0x234] sm:$0xf0]  ;;  %v2113_v21 = vor.u32 %v2492_v11, %v2110_v13  ;;  %v2177_v22 = vor.u32 %v2510_v15, %v2176_v14  ;;  %v2490_v23 = vld [vmem:[#allocation6 + $0x234] sm:$0xf]  ;;  %v2102_v24 = vld [vmem:[#allocation6 + $0x238] sm:$0xf0] }
  0x70   : > { %v2168_v25 = vld [vmem:[#allocation6 + $0x2b0] sm:$0xf]  ;;  %v2508_v27 = vld [vmem:[#allocation6 + $0x2b4] sm:$0xf0]  ;;  %v2507_v28 = vld [vmem:[#allocation6 + $0x2b4] sm:$0xf]  ;;  %v2101_v33 = vor.u32 %v2491_v20, %v2100_v19 }
  0x71   : > { %640 = vmatpush.bf16.msrb.mxu0 %v1941_v31  ;;  %v2170_v29 = vld [vmem:[#allocation6 + $0x2b8] sm:$0xf0]  ;;  %v2092_v30 = vld [vmem:[#allocation6 + $0x220] sm:$0xf]  ;;  %v2489_v31 = vld [vmem:[#allocation6 + $0x224] sm:$0xf0]  ;;  %v2169_v38 = vor.u32 %v2508_v27, %v2168_v25 }
  0x72   : > { %654 = vmatpush.bf16.msrb.mxu1 %v1945_v32  ;;  %v2140_v32 = vld [vmem:[%s2941_s30] sm:$0xc]  ;;  %v2488_v34 = vld [vmem:[#allocation6 + $0x224] sm:$0xf]  ;;  %v2500_v35 = vld [vmem:[%s2941_s30] sm:$0xf0]  ;;  %v2173_v43 = vor.u32 %v2507_v28, %v2170_v29  ;;  %v2093_v52 = vor.u32 %v2489_v31, %v2092_v30 }
  0x73   : > { %807 = vmatpush.bf16.msrb.mxu2 %v2009_v36  ;;  %821 = vmatpush.bf16.msrb.mxu3 %v2013_v37  ;;  %v995_v36 = vld [vmem:[%s2941_s30 + $0x8] sm:$0x7]  ;;  %v2105_v37 = vor.u32 %v2490_v23, %v2102_v24  ;;  %v2094_v39 = vld [vmem:[#allocation6 + $0x228] sm:$0xf0]  ;;  %v2160_v40 = vld [vmem:[#allocation6 + $0x2a0] sm:$0xf]  ;;  %v2141_v47 = vor.u32 %v2500_v35, %v2140_v32 }
  0x74   : > { %641 = vmatmul.bf16.vlgmr.msrb.gmra.mxu0 %v551_v54  ;;  %v2506_v41 = vld [vmem:[#allocation6 + $0x2a4] sm:$0xf0]  ;;  %v2505_v44 = vld [vmem:[#allocation6 + $0x2a4] sm:$0xf]  ;;  %v2084_v48 = vld [vmem:[#allocation6 + $0x210] sm:$0xf]  ;;  %v2097_v56 = vor.u32 %v2488_v34, %v2094_v39 }
  0x75   : > { %953 = vmatpush.bf16.msra.mxu0 %v2133_v42  ;;  %655 = vmatmul.bf16.vlgmr.msrb.gmra.mxu1 %v551_v54  ;;  %v1018_v42 = vunpack.c.l.b16 %v995_v36  ;;  %v2487_v49 = vld [vmem:[#allocation6 + $0x214] sm:$0xf0]  ;;  %v2086_v53 = vld [vmem:[#allocation6 + $0x218] sm:$0xf0]  ;;  %v2152_v54 = vld [vmem:[#allocation6 + $0x290] sm:$0xf] }
  0x76   : > { %967 = vmatpush.bf16.msra.mxu1 %v2137_v45  ;;  %822 = vmatmul.bf16.vlgmr.msrb.gmra.mxu3 %v718_v57  ;;  %v2162_v45 = vld [vmem:[#allocation6 + $0x2a8] sm:$0xf0]  ;;  %v2504_v55 = vld [vmem:[#allocation6 + $0x294] sm:$0xf0]  ;;  %v2072_v61 = vld [vmem:[%s2941_s30] sm:$0xc] }
  0x77   : > { %1120 = vmatpush.bf16.msra.mxu2 %v2201_v46  ;;  %1134 = vmatpush.bf16.msra.mxu3 %v2205_v50  ;;  %v842_v46 = vld [vmem:[%s2941_s30 + $0x8] sm:$0x3]  ;;  %v2486_v50 = vld [vmem:[#allocation6 + $0x214] sm:$0xf]  ;;  %v1020_v51 = vpack.c.b16 %v1018_v42, %v1018_v42  ;;  %v2483_v63 = vld [vmem:[%s2941_s30] sm:$0xf0]  ;;  %v2153_v9 = vor.u32 %v2504_v55, %v2152_v54 }
  0x78   : > { %808 = vmatmul.bf16.vlgmr.msrb.gmra.mxu2 %v718_v57  ;;  %v2161_v57 = vor.u32 %v2506_v41, %v2160_v40  ;;  %v865_v62 = vunpack.c.l.b16 %v842_v46  ;;  %v1026_v1 = vshll.u32 %v2141_v47, 16  ;;  %v2076_v4 = vld [vmem:[#allocation6 + $0x200] sm:$0xf]  ;;  %v2485_v5 = vld [vmem:[#allocation6 + $0x204] sm:$0xf0]  ;;  %v2073_v17 = vor.u32 %v2483_v63, %v2072_v61  ;;  %s1695_s4 = sshll.u32 %s1692_s28, 4  ;;  %s1696_s4 = int_to_ptr.hbm [resolvable:$true] %s1695_s4 }
  0x79   : > { %954 = vmatpush.bf16.msra.mxu0 %v2125_v58  ;;  %v2165_v58 = vor.u32 %v2505_v44, %v2162_v45  ;;  %v1031_v2 = vshrl.u32 %v1020_v51, 16  ;;  %v1034_v3 = vshll.u32 %v1020_v51, 16  ;;  %v2078_v10 = vld [vmem:[#allocation6 + $0x208] sm:$0xf0]  ;;  %v2144_v11 = vld [vmem:[#allocation6 + $0x280] sm:$0xf]  ;;  %v2077_v25 = vor.u32 %v2485_v5, %v2076_v4 }
  0x7a   : > { %968 = vmatpush.bf16.msra.mxu1 %v2129_v59  ;;  %v2503_v59 = vld [vmem:[#allocation6 + $0x294] sm:$0xf]  ;;  %v2501_v14 = vld [vmem:[#allocation6 + $0x284] sm:$0xf]  ;;  %v2146_v15 = vld [vmem:[#allocation6 + $0x288] sm:$0xf0] }
  0x7b   : > { %1121 = vmatpush.bf16.msra.mxu2 %v2193_v60  ;;  %1135 = vmatpush.bf16.msra.mxu3 %v2197_v0  ;;  %v2154_v60 = vld [vmem:[#allocation6 + $0x298] sm:$0xf0]  ;;  %v1023_v0 = vshrl.u32 %v2141_v47, 16  ;;  %v2268_v16 = vld [vmem:[#allocation6 + $0x370] sm:$0xf]  ;;  %v1036_v23 = vrot.slane %v1034_v3, 3  ;;  %v2149_v31 = vor.u32 %v2501_v14, %v2146_v15 }
  0x7c   : > { %v2157_v13 = vor.u32 %v2503_v59, %v2154_v60  ;;  %v2533_v19 = vld [vmem:[#allocation6 + $0x374] sm:$0xf0]  ;;  %v2532_v24 = vld [vmem:[#allocation6 + $0x374] sm:$0xf]  ;;  %v2270_v28 = vld [vmem:[#allocation6 + $0x378] sm:$0xf0] }
  0x7d   : > { %955 = vmatpush.bf16.msra.mxu0 %v2117_v6  ;;  %v2484_v6 = vld [vmem:[#allocation6 + $0x204] sm:$0xf]  ;;  %v1025_v20 = vrot.slane %v1023_v0, 2  ;;  %v2336_v29 = vld [vmem:[#allocation6 + $0x3f0] sm:$0xf]  ;;  %v2269_v32 = vor.u32 %v2533_v19, %v2268_v16  ;;  %v869_v35 = vrot.slane %v2073_v17, 2  ;;  %v2273_v39 = vor.u32 %v2532_v24, %v2270_v28 }
  0x7e   : > { %969 = vmatpush.bf16.msra.mxu1 %v2121_v7  ;;  %v2085_v7 = vor.u32 %v2487_v49, %v2084_v48  ;;  %v2550_v30 = vld [vmem:[#allocation6 + $0x3f4] sm:$0xf0]  ;;  %v2338_v34 = vld [vmem:[#allocation6 + $0x3f8] sm:$0xf0]  ;;  %vm1021_vm4 = vsmask.f32 5376 }
  0x7f   : > { %1122 = vmatpush.bf16.msra.mxu2 %v2185_v8  ;;  %1136 = vmatpush.bf16.msra.mxu3 %v2189_v12  ;;  %v2089_v8 = vor.u32 %v2486_v50, %v2086_v53  ;;  %v2502_v12 = vld [vmem:[#allocation6 + $0x284] sm:$0xf0]  ;;  %v2337_v40 = vor.u32 %v2550_v30, %v2336_v29  ;;  %v2260_v41 = vld [vmem:[#allocation6 + $0x360] sm:$0xf]  ;;  %v2262_v45 = vld [vmem:[#allocation6 + $0x368] sm:$0xf0] }
  0x80   : > { %v2145_v27 = vor.u32 %v2502_v12, %v2144_v11  ;;  %v2531_v42 = vld [vmem:[#allocation6 + $0x364] sm:$0xf0]  ;;  %v2328_v46 = vld [vmem:[#allocation6 + $0x3e0] sm:$0xf]  ;;  %v2547_v49 = vld [vmem:[#allocation6 + $0x3e4] sm:$0xf] }
  0x81   : > { %956 = vmatpush.bf16.msra.mxu0 %v2109_v18  ;;  %v867_v18 = vpack.c.b16 %v865_v62, %v865_v62  ;;  %v2548_v47 = vld [vmem:[#allocation6 + $0x3e4] sm:$0xf0]  ;;  %v2330_v50 = vld [vmem:[#allocation6 + $0x3e8] sm:$0xf0]  ;;  %v2252_v55 = vld [vmem:[#allocation6 + $0x350] sm:$0xf] }
  0x82   : > { %970 = vmatpush.bf16.msra.mxu1 %v2113_v21  ;;  %v1028_v21 = vrot.slane %v1026_v1, 3  ;;  %v2329_v54 = vor.u32 %v2548_v47, %v2328_v46  ;;  %v2254_v59 = vld [vmem:[#allocation6 + $0x358] sm:$0xf0]  ;;  %v2320_v60 = vld [vmem:[#allocation6 + $0x3d0] sm:$0xf]  ;;  %s1681_s5 = scalar_lea.sflag [#allocation5], %s2937_s24 }
  0x83   : > { %1123 = vmatpush.bf16.msra.mxu2 %v2177_v22  ;;  %1137 = vmatpush.bf16.msra.mxu3 %v2181_v26  ;;  %v1033_v22 = vrot.slane %v1031_v2, 2  ;;  %v2081_v26 = vor.u32 %v2484_v6, %v2078_v10  ;;  %v870_v36 = vrot.slane %v867_v18, 2  ;;  %v2546_v61 = vld [vmem:[#allocation6 + $0x3d4] sm:$0xf0]  ;;  %v2545_v62 = vld [vmem:[#allocation6 + $0x3d4] sm:$0xf] }
  0x84   : > { %v2322_v63 = vld [vmem:[#allocation6 + $0x3d8] sm:$0xf0]  ;;  %v2321_v2 = vor.u32 %v2546_v61, %v2320_v60  ;;  %v2244_v3 = vld [vmem:[#allocation6 + $0x340] sm:$0xf]  ;;  %v2527_v4 = vld [vmem:[#allocation6 + $0x344] sm:$0xf0] }
  0x85   : > { %957 = vmatpush.bf16.msra.mxu0 %v2101_v33  ;;  %v2549_v33 = vld [vmem:[#allocation6 + $0x3f4] sm:$0xf]  ;;  %v871_v48 = vsel %vm868_vm3, %v869_v35, %v870_v36  ;;  %v2526_v5 = vld [vmem:[#allocation6 + $0x344] sm:$0xf]  ;;  %v2325_v6 = vor.u32 %v2545_v62, %v2322_v63  ;;  %v2314_v11 = vld [vmem:[#allocation6 + $0x3c8] sm:$0xf0] }
  0x86   : > { %971 = vmatpush.bf16.msra.mxu1 %v2105_v37  ;;  %v1029_v37 = vor.u32 %v1028_v21, %v1025_v20  ;;  %v2341_v44 = vor.u32 %v2549_v33, %v2338_v34  ;;  %v2543_v10 = vld [vmem:[#allocation6 + $0x3c4] sm:$0xf]  ;;  %v1315_v12 = vld [vmem:[%s2941_s30 + $0x8] sm:$0xf]  ;;  %v2525_v15 = vld [vmem:[#allocation6 + $0x334] sm:$0xf0] }
  0x87   : > { %1124 = vmatpush.bf16.msra.mxu2 %v2169_v38  ;;  %1138 = vmatpush.bf16.msra.mxu3 %v2173_v43  ;;  %v1037_v38 = vor.u32 %v1036_v23, %v1033_v22  ;;  %v2530_v43 = vld [vmem:[#allocation6 + $0x364] sm:$0xf]  ;;  %v2236_v14 = vld [vmem:[#allocation6 + $0x330] sm:$0xf]  ;;  %v2524_v18 = vld [vmem:[#allocation6 + $0x334] sm:$0xf]  ;;  %v1338_v21 = vunpack.c.l.b16 %v1315_v12  ;;  %v2317_v22 = vor.u32 %v2543_v10, %v2314_v11 }
  0x88   : > { %v2265_v53 = vor.u32 %v2530_v43, %v2262_v45  ;;  %v2238_v19 = vld [vmem:[#allocation6 + $0x338] sm:$0xf0]  ;;  %v2304_v20 = vld [vmem:[#allocation6 + $0x3b0] sm:$0xf]  ;;  %v2542_v23 = vld [vmem:[#allocation6 + $0x3b4] sm:$0xf0]  ;;  %v2237_v29 = vor.u32 %v2525_v15, %v2236_v14 }
  0x89   : > { %958 = vmatpush.bf16.msra.mxu0 %v2093_v52  ;;  %v1038_v51 = vsel %vm1021_vm4, %v1029_v37, %v1037_v38  ;;  %v2261_v52 = vor.u32 %v2531_v42, %v2260_v41  ;;  %v2276_v24 = vld [vmem:[%s2941_s30] sm:$0x8]  ;;  %v2228_v28 = vld [vmem:[#allocation6 + $0x320] sm:$0xf]  ;;  %v2241_v30 = vor.u32 %v2524_v18, %v2238_v19  ;;  %v2230_v33 = vld [vmem:[#allocation6 + $0x328] sm:$0xf0]  ;;  %v2305_v34 = vor.u32 %v2542_v23, %v2304_v20 }
  0x8a   : > { %972 = vmatpush.bf16.msra.mxu1 %v2097_v56  ;;  %v2529_v56 = vld [vmem:[#allocation6 + $0x354] sm:$0xf0]  ;;  %v2296_v35 = vld [vmem:[#allocation6 + $0x3a0] sm:$0xf]  ;;  %v2540_v36 = vld [vmem:[#allocation6 + $0x3a4] sm:$0xf0] }
  0x8b   : > { %1125 = vmatpush.bf16.msra.mxu2 %v2161_v57  ;;  %1139 = vmatpush.bf16.msra.mxu3 %v2165_v58  ;;  %v2528_v57 = vld [vmem:[#allocation6 + $0x354] sm:$0xf]  ;;  %v2333_v58 = vor.u32 %v2547_v49, %v2330_v50  ;;  %v2253_v0 = vor.u32 %v2529_v56, %v2252_v55  ;;  %v1162_v37 = vld [vmem:[%s2941_s30 + $0x8] sm:$0x7]  ;;  %v2539_v41 = vld [vmem:[#allocation6 + $0x3a4] sm:$0xf]  ;;  %v2297_v49 = vor.u32 %v2540_v36, %v2296_v35 }
  0x8c   : > { %v2257_v1 = vor.u32 %v2528_v57, %v2254_v59  ;;  %v2298_v42 = vld [vmem:[#allocation6 + $0x3a8] sm:$0xf0]  ;;  %v2220_v43 = vld [vmem:[#allocation6 + $0x310] sm:$0xf]  ;;  %v2520_v45 = vld [vmem:[#allocation6 + $0x314] sm:$0xf] }
  0x8d   : > { %959 = vmatpush.bf16.msra.mxu0 %v2085_v7  ;;  %v2246_v7 = vld [vmem:[#allocation6 + $0x348] sm:$0xf0]  ;;  %v2222_v46 = vld [vmem:[#allocation6 + $0x318] sm:$0xf0]  ;;  %v2288_v50 = vld [vmem:[#allocation6 + $0x390] sm:$0xf]  ;;  %v2301_v59 = vor.u32 %v2539_v41, %v2298_v42 }
  0x8e   : > { %973 = vmatpush.bf16.msra.mxu1 %v2089_v8  ;;  %v2312_v8 = vld [vmem:[#allocation6 + $0x3c0] sm:$0xf]  ;;  %v2249_v16 = vor.u32 %v2526_v5, %v2246_v7  ;;  %v2537_v61 = vld [vmem:[#allocation6 + $0x394] sm:$0xf]  ;;  %v2290_v62 = vld [vmem:[#allocation6 + $0x398] sm:$0xf0]  ;;  %v2225_v63 = vor.u32 %v2520_v45, %v2222_v46 }
  0x8f   : > { %1126 = vmatpush.bf16.msra.mxu2 %v2153_v9  ;;  %1140 = vmatpush.bf16.msra.mxu3 %v2157_v13  ;;  %v2544_v9 = vld [vmem:[#allocation6 + $0x3c4] sm:$0xf0]  ;;  %v2245_v13 = vor.u32 %v2527_v4, %v2244_v3  ;;  %v2518_v3 = vld [vmem:[#allocation6 + $0x304] sm:$0xf]  ;;  %v2293_v11 = vor.u32 %v2537_v61, %v2290_v62  ;;  %v2280_v12 = vld [vmem:[#allocation6 + $0x380] sm:$0xf] }
  0x90   : > { %v2313_v17 = vor.u32 %v2544_v9, %v2312_v8  ;;  %v2535_v14 = vld [vmem:[#allocation6 + $0x384] sm:$0xf]  ;;  %v2282_v15 = vld [vmem:[#allocation6 + $0x388] sm:$0xf0]  ;;  %v2566_v20 = vld [vmem:[#allocation6 + $0x474] sm:$0xf] }
  0x91   : > { %960 = vmatpush.bf16.msra.mxu0 %v2077_v25  ;;  %v2534_v25 = vld [vmem:[%s2941_s30] sm:$0xf0]  ;;  %vm1341_vm6 = vsmask.f32 4352  ;;  %v2390_v41 = vld [vmem:[#allocation6 + $0x458] sm:$0xf0] }
  0x92   : > { %974 = vmatpush.bf16.msra.mxu1 %v2081_v26  ;;  %v2541_v26 = vld [vmem:[#allocation6 + $0x3b4] sm:$0xf]  ;;  %v2277_v38 = vor.u32 %v2534_v25, %v2276_v24  ;;  %v2561_v45 = vld [vmem:[#allocation6 + $0x444] sm:$0xf0]  ;;  %v2560_v46 = vld [vmem:[#allocation6 + $0x444] sm:$0xf] }
  0x93   : > { %1127 = vmatpush.bf16.msra.mxu2 %v2145_v27  ;;  %1141 = vmatpush.bf16.msra.mxu3 %v2149_v31  ;;  %v2306_v27 = vld [vmem:[#allocation6 + $0x3b8] sm:$0xf0]  ;;  %v2523_v31 = vld [vmem:[#allocation6 + $0x324] sm:$0xf0]  ;;  %v2356_v62 = vld [vmem:[#allocation6 + $0x410] sm:$0xf] }
  0x94   : > { %961 = vmatmul.bf16.vlgmr.msra.gmra.mxu0 %v871_v48  ;;  %v2229_v47 = vor.u32 %v2523_v31, %v2228_v28  ;;  %v1343_v55 = vshrl.u32 %v2277_v38, 16  ;;  %v1346_v56 = vshll.u32 %v2277_v38, 16  ;;  %v2565_v31 = vld [vmem:[#allocation6 + $0x464] sm:$0xf0]  ;;  %v2388_v38 = vld [vmem:[#allocation6 + $0x450] sm:$0xf] }
  0x95   : > { %1273 = vmatpush.bf16.msrb.mxu0 %v2269_v32  ;;  %975 = vmatmul.bf16.vlgmr.msra.gmra.mxu1 %v871_v48  ;;  %v2522_v32 = vld [vmem:[#allocation6 + $0x324] sm:$0xf]  ;;  %s2755_s7 = sshra.s32 %s1696_s4, 4  ;;  %s2761_s11 = scalar_lea.hbm %s3018_s3, 32  ;;  %s2756_s7 = int_to_ptr.hbm [resolvable:$true] %s2755_s7 }
  0x96   : > { %1287 = vmatpush.bf16.msrb.mxu1 %v2273_v39  ;;  %1142 = vmatmul.bf16.vlgmr.msra.gmra.mxu3 %v1038_v51  ;;  %v1340_v39 = vpack.c.b16 %v1338_v21, %v1338_v21  ;;  %v2233_v48 = vor.u32 %v2522_v32, %v2230_v33  ;;  %v1345_v7 = vrot.slane %v1343_v55, 3  ;;  %v1348_v8 = vrot.slane %v1346_v56, 4  ;;  %v2406_v21 = vld [vmem:[#allocation6 + $0x478] sm:$0xf0]  ;;  %v2564_v33 = vld [vmem:[#allocation6 + $0x464] sm:$0xf]  ;;  %p2762_p11 = scmp.lt.s32.totalorder %s2756_s7, %s3018_s3 }
  0x97   : > { %1440 = vmatpush.bf16.msrb.mxu2 %v2337_v40  ;;  %1454 = vmatpush.bf16.msrb.mxu3 %v2341_v44  ;;  %v2309_v40 = vor.u32 %v2541_v26, %v2306_v27  ;;  %v2521_v44 = vld [vmem:[#allocation6 + $0x314] sm:$0xf0]  ;;  %v2285_v27 = vor.u32 %v2535_v14, %v2282_v15  ;;  %v2364_v56 = vld [vmem:[#allocation6 + $0x420] sm:$0xf]  ;;  %s2757_s8 = scalar_lea.hbm %s2756_s7, 16 }
  0x98   : > { %1128 = vmatmul.bf16.vlgmr.msra.gmra.mxu2 %v1038_v51  ;;  %v2538_v51 = vld [vmem:[#allocation6 + $0x394] sm:$0xf0]  ;;  %v1351_v57 = vshrl.u32 %v1340_v39, 16  ;;  %v2221_v60 = vor.u32 %v2521_v44, %v2220_v43  ;;  %v1349_v25 = vor.u32 %v1348_v8, %v1345_v7  ;;  %v2380_v44 = vld [vmem:[#allocation6 + $0x440] sm:$0xf]  ;;  %p2758_p1 = scmp.ne.s32.totalorder %s2756_s7, %s2757_s8  ;;  %p2763_p9 = scmp.lt.s32.totalorder %s2761_s11, %s2757_s8 }
  0x99   : > { %1274 = vmatpush.bf16.msrb.mxu0 %v2261_v52  ;;  %v2208_v52 = vld [vmem:[%s2941_s30] sm:$0x8]  ;;  %v2350_v7 = vld [vmem:[#allocation6 + $0x408] sm:$0xf0] }
  0x9a   : > { %1288 = vmatpush.bf16.msrb.mxu1 %v2265_v53  ;;  %v1185_v53 = vunpack.c.l.b16 %v1162_v37  ;;  %v1353_v9 = vrot.slane %v1351_v57, 3  ;;  %v2557_v57 = vld [vmem:[#allocation6 + $0x424] sm:$0xf0]  ;;  %p2759_p4 = pnand %p2758_p1, %p2907_p3  ;;  %p2764_p2 = por %p2763_p9, %p2762_p11 }
  0x9b   : > { %1441 = vmatpush.bf16.msrb.mxu2 %v2329_v54  ;;  %1455 = vmatpush.bf16.msrb.mxu3 %v2333_v58  ;;  %v2517_v54 = vld [vmem:[%s2941_s30] sm:$0xf0]  ;;  %v1354_v58 = vshll.u32 %v1340_v39, 16 }
  0x9c   : > { %v2209_v4 = vor.u32 %v2517_v54, %v2208_v52  ;;  %v1187_v5 = vpack.c.b16 %v1185_v53, %v1185_v53  ;;  %v2563_v39 = vld [vmem:[#allocation6 + $0x454] sm:$0xf0]  ;;  %v2558_v52 = vld [vmem:[#allocation6 + $0x434] sm:$0xf]  ;;  %v2374_v53 = vld [vmem:[#allocation6 + $0x438] sm:$0xf0]  ;;  %p2760_p8 = pneg %p2759_p4 }
  0x9d   : > { %1275 = vmatpush.bf16.msrb.mxu0 %v2253_v0  ;;  %v2289_v0 = vor.u32 %v2538_v51, %v2288_v50  ;;  %v1356_v10 = vrot.slane %v1354_v58, 4  ;;  %v2389_v42 = vor.u32 %v2563_v39, %v2388_v38  ;;  %v2372_v50 = vld [vmem:[#allocation6 + $0x430] sm:$0xf]  ;;  %v2559_v51 = vld [vmem:[#allocation6 + $0x434] sm:$0xf0]  ;;  %v2377_v55 = vor.u32 %v2558_v52, %v2374_v53 }
  0x9e   : > { %1289 = vmatpush.bf16.msrb.mxu1 %v2257_v1  ;;  %v2212_v1 = vld [vmem:[#allocation6 + $0x300] sm:$0xf]  ;;  %v1190_v23 = vrot.slane %v1187_v5, 3  ;;  %v2373_v54 = vor.u32 %v2559_v51, %v2372_v50  ;;  %v2556_v58 = vld [vmem:[#allocation6 + $0x424] sm:$0xf]  ;;  %p2765_p10 = pnand %p2764_p2, %p2760_p8 }
  0x9f   : > { %1442 = vmatpush.bf16.msrb.mxu2 %v2321_v2  ;;  %1456 = vmatpush.bf16.msrb.mxu3 %v2325_v6  ;;  %v2519_v2 = vld [vmem:[#allocation6 + $0x304] sm:$0xf0]  ;;  %v2214_v6 = vld [vmem:[#allocation6 + $0x308] sm:$0xf0]  ;;  %v1357_v26 = vor.u32 %v1356_v10, %v1353_v9 }
  0xa0   : > { %v2213_v18 = vor.u32 %v2519_v2, %v2212_v1  ;;  %v2217_v19 = vor.u32 %v2518_v3, %v2214_v6  ;;  %v2358_v1 = vld [vmem:[#allocation6 + $0x418] sm:$0xf0]  ;;  %v2553_v5 = vld [vmem:[#allocation6 + $0x404] sm:$0xf0]  ;;  %v2552_v6 = vld [vmem:[#allocation6 + $0x404] sm:$0xf] }
  0xa1   : > { %1276 = vmatpush.bf16.msrb.mxu0 %v2245_v13  ;;  %v2536_v13 = vld [vmem:[#allocation6 + $0x384] sm:$0xf0]  ;;  %v1358_v35 = vsel %vm1341_vm6, %v1349_v25, %v1357_v26  ;;  %v2353_v9 = vor.u32 %v2552_v6, %v2350_v7  ;;  %v2551_v10 = vld [vmem:[%s2941_s30 + $0x4] sm:$0xff] }
  0xa2   : > { %1290 = vmatpush.bf16.msrb.mxu1 %v2249_v16  ;;  %v2404_v16 = vld [vmem:[#allocation6 + $0x470] sm:$0xf]  ;;  %v2281_v24 = vor.u32 %v2536_v13, %v2280_v12 }
  0xa3   : > { %1443 = vmatpush.bf16.msrb.mxu2 %v2313_v17  ;;  %1457 = vmatpush.bf16.msrb.mxu3 %v2317_v22  ;;  %v2567_v17 = vld [vmem:[#allocation6 + $0x474] sm:$0xf0]  ;;  %v1189_v22 = vrot.slane %v2209_v4, 3  ;;  %v2348_v4 = vld [vmem:[#allocation6 + $0x400] sm:$0xf] }
  0xa4   : > { %v2405_v28 = vor.u32 %v2567_v17, %v2404_v16  ;;  %v2349_v8 = vor.u32 %v2553_v5, %v2348_v4 }
  0xa5   : > { %1277 = vmatpush.bf16.msrb.mxu0 %v2237_v29  ;;  %v2409_v29 = vor.u32 %v2566_v20, %v2406_v21  ;;  %v1191_v32 = vsel %vm1188_vm5, %v1189_v22, %v1190_v23 }
  0xa6   : > { %1291 = vmatpush.bf16.msrb.mxu1 %v2241_v30  ;;  %v2396_v30 = vld [vmem:[#allocation6 + $0x460] sm:$0xf] }
  0xa7   : > { %1444 = vmatpush.bf16.msrb.mxu2 %v2305_v34  ;;  %1458 = vmatpush.bf16.msrb.mxu3 %v2309_v40  ;;  %v2398_v34 = vld [vmem:[#allocation6 + $0x468] sm:$0xf0]  ;;  %v2397_v36 = vor.u32 %v2565_v31, %v2396_v30  ;;  %v2562_v40 = vld [vmem:[#allocation6 + $0x454] sm:$0xf] }
  0xa8   : > { %v2401_v37 = vor.u32 %v2564_v33, %v2398_v34  ;;  %v2393_v43 = vor.u32 %v2562_v40, %v2390_v41 }
  0xa9   : > { %1278 = vmatpush.bf16.msrb.mxu0 %v2229_v47  ;;  %v2382_v47 = vld [vmem:[#allocation6 + $0x448] sm:$0xf0] }
  0xaa   : > { %1292 = vmatpush.bf16.msrb.mxu1 %v2233_v48  ;;  %v2381_v48 = vor.u32 %v2561_v45, %v2380_v44  ;;  %v2977_v44 = vld [vmem:[#allocation8] sm:$0x3] }
  0xab   : > { %1445 = vmatpush.bf16.msrb.mxu2 %v2297_v49  ;;  %1459 = vmatpush.bf16.msrb.mxu3 %v2301_v59  ;;  %v2385_v49 = vor.u32 %v2560_v46, %v2382_v47  ;;  %v2366_v59 = vld [vmem:[#allocation6 + $0x428] sm:$0xf0]  ;;  %v1632_v50 = vperm.slane %v2977_v44, 1 }
  0xac   : > { %v2369_v61 = vor.u32 %v2556_v58, %v2366_v59 }
  0xad   : > { %1279 = vmatpush.bf16.msrb.mxu0 %v2221_v60  ;;  %v2365_v60 = vor.u32 %v2557_v57, %v2364_v56 }
  0xae   : > { %1293 = vmatpush.bf16.msrb.mxu1 %v2225_v63  ;;  %v2555_v63 = vld [vmem:[#allocation6 + $0x414] sm:$0xf0] }
  0xaf   : > { %1446 = vmatpush.bf16.msrb.mxu2 %v2289_v0  ;;  %1460 = vmatpush.bf16.msrb.mxu3 %v2293_v11  ;;  %v2554_v0 = vld [vmem:[#allocation6 + $0x414] sm:$0xf]  ;;  %v2357_v2 = vor.u32 %v2555_v63, %v2356_v62 }
  0xb0   : > { %v2361_v3 = vor.u32 %v2554_v0, %v2358_v1 }
  0xb1   : > { %1280 = vmatpush.bf16.msrb.mxu0 %v2213_v18 }
  0xb2   : > { %1294 = vmatpush.bf16.msrb.mxu1 %v2217_v19 }
  0xb3   : > { %1447 = vmatpush.bf16.msrb.mxu2 %v2281_v24  ;;  %1461 = vmatpush.bf16.msrb.mxu3 %v2285_v27 }
  0xb4   : > { %1281 = vmatmul.bf16.vlgmr.msrb.gmra.mxu0 %v1191_v32 }
  0xb5   : > { %1585 = vmatpush.bf16.msra.mxu0 %v2405_v28  ;;  %1295 = vmatmul.bf16.vlgmr.msrb.gmra.mxu1 %v1191_v32 }
  0xb6   : > { %1599 = vmatpush.bf16.msra.mxu1 %v2409_v29  ;;  %1448 = vmatmul.bf16.vlgmr.msrb.gmra.mxu2 %v1358_v35 }
  0xb7   : > { %1462 = vmatmul.bf16.vlgmr.msrb.gmra.mxu3 %v1358_v35 }
  0xb9   : > { %1586 = vmatpush.bf16.msra.mxu0 %v2397_v36 }
  0xba   : > { %1600 = vmatpush.bf16.msra.mxu1 %v2401_v37 }
  0xbd   : > { %1587 = vmatpush.bf16.msra.mxu0 %v2389_v42 }
  0xbe   : > { %1601 = vmatpush.bf16.msra.mxu1 %v2393_v43 }
  0xc1   : > { %1588 = vmatpush.bf16.msra.mxu0 %v2381_v48 }
  0xc2   : > { %1602 = vmatpush.bf16.msra.mxu1 %v2385_v49 }
  0xc5   : > { %1589 = vmatpush.bf16.msra.mxu0 %v2373_v54 }
  0xc6   : > { %1603 = vmatpush.bf16.msra.mxu1 %v2377_v55 }
  0xc9   : > { %1590 = vmatpush.bf16.msra.mxu0 %v2365_v60 }
  0xca   : > { %1604 = vmatpush.bf16.msra.mxu1 %v2369_v61 }
  0xcd   : > { %1591 = vmatpush.bf16.msra.mxu0 %v2357_v2 }
  0xce   : > { %1605 = vmatpush.bf16.msra.mxu1 %v2361_v3 }
  0xd1   : > { %1592 = vmatpush.bf16.msra.mxu0 %v2349_v8  ;;  %v335_v21 = vpop.f32.mrf.mxu0 }
  0xd2   : > { %1606 = vmatpush.bf16.msra.mxu1 %v2353_v9  ;;  %v349_v11 = vpop.f32.mrf.mxu1 }
  0xd4   : > { %1593 = vmatmul.bf16.vlgmr.msra.gmra.mxu0 %v2551_v10 }
  0xd5   : > { %1607 = vmatmul.bf16.vlgmr.msra.gmra.mxu1 %v2551_v10 }
  0xd9   : > { %v337_v24 = vpop.f32.mrf.mxu0 }
  0xda   : > { %v351_v12 = vpop.f32.mrf.mxu1 }
  0xdb   : > { %v503_v13 = vpop.f32.mrf.mxu3  ;;  %v489_v27 = vpop.f32.mrf.mxu2 }
  0xdc   : > { %v513_v26 = vadd.f32 %v503_v13, %v349_v11  ;;  %v512_v10 = vadd.f32 %v489_v27, %v335_v21 }
  0xe3   : > { %v505_v15 = vpop.f32.mrf.mxu3  ;;  %v491_v38 = vpop.f32.mrf.mxu2 }
  0xe4   : > { %v515_v30 = vadd.f32 %v505_v15, %v351_v12 }
  0xf1   : > { %v642_v32 = vpop.f32.mrf.mxu0 }
  0xf2   : > { %v656_v14 = vpop.f32.mrf.mxu1  ;;  %v665_v15 = vadd.f32 %v642_v32, %v512_v10 }
  0xf3   : > { %v666_v31 = vadd.f32 %v656_v14, %v513_v26  ;;  %v514_v14 = vadd.f32 %v491_v38, %v337_v24 }
  0xf9   : > { %v823_v17 = vpop.f32.mrf.mxu3  ;;  %v644_v45 = vpop.f32.mrf.mxu0 }
  0xfa   : > { %v658_v16 = vpop.f32.mrf.mxu1  ;;  %v833_v33 = vadd.f32 %v823_v17, %v666_v31 }
  0xfb   : > { %v668_v34 = vadd.f32 %v658_v16, %v515_v30  ;;  %v809_v53 = vpop.f32.mrf.mxu2 }
 0x101   : > { %v825_v19 = vpop.f32.mrf.mxu3 }
 0x102   : > { %v835_v35 = vadd.f32 %v825_v19, %v668_v34  ;;  %v667_v19 = vadd.f32 %v644_v45, %v514_v14 }
 0x103   : > { %v811_v61 = vpop.f32.mrf.mxu2 }
 0x111   : > { %v962_v57 = vpop.f32.mrf.mxu0 }
 0x112   : > { %v976_v18 = vpop.f32.mrf.mxu1 }
 0x113   : > { %v986_v36 = vadd.f32 %v976_v18, %v833_v33 }
 0x119   : > { %v1143_v22 = vpop.f32.mrf.mxu3  ;;  %v964_v0 = vpop.f32.mrf.mxu0 }
 0x11a   : > { %v978_v20 = vpop.f32.mrf.mxu1  ;;  %v1153_v39 = vadd.f32 %v1143_v22, %v986_v36 }
 0x11b   : > { %v988_v40 = vadd.f32 %v978_v20, %v835_v35  ;;  %v1129_v6 = vpop.f32.mrf.mxu2  ;;  %v832_v20 = vadd.f32 %v809_v53, %v665_v15 }
 0x11d   : > { %v985_v26 = vadd.f32 %v962_v57, %v832_v20 }
 0x11f   : > { %v1152_v27 = vadd.f32 %v1129_v6, %v985_v26 }
 0x121   : > { %v1145_v25 = vpop.f32.mrf.mxu3 }
 0x122   : > { %v1155_v41 = vadd.f32 %v1145_v25, %v988_v40  ;;  %v834_v25 = vadd.f32 %v811_v61, %v667_v19 }
 0x123   : > { %v1131_v12 = vpop.f32.mrf.mxu2 }
 0x124   : > { %v987_v21 = vadd.f32 %v964_v0, %v834_v25 }
 0x126   : > { %v1154_v31 = vadd.f32 %v1131_v12, %v987_v21 }
 0x131   : > { %v1282_v7 = vpop.f32.mrf.mxu0 }
 0x132   : > { %v1296_v23 = vpop.f32.mrf.mxu1  ;;  %v1305_v32 = vadd.f32 %v1282_v7, %v1152_v27 }
 0x133   : > { %v1306_v42 = vadd.f32 %v1296_v23, %v1153_v39 }
 0x139   : > { %v1284_v17 = vpop.f32.mrf.mxu0 }
 0x13a   : > { %v1298_v28 = vpop.f32.mrf.mxu1  ;;  %v1463_v29 = vpop.f32.mrf.mxu3  ;;  %v1307_v35 = vadd.f32 %v1284_v17, %v1154_v31 }
 0x13b   : > { %v1473_v46 = vadd.f32 %v1463_v29, %v1306_v42  ;;  %v1308_v47 = vadd.f32 %v1298_v28, %v1155_v41  ;;  %v1449_v28 = vpop.f32.mrf.mxu2 }
 0x142   : > { %v1465_v43 = vpop.f32.mrf.mxu3 }
 0x143   : > { %v1475_v48 = vadd.f32 %v1465_v43, %v1308_v47  ;;  %v1451_v34 = vpop.f32.mrf.mxu2  ;;  %v1631_v43 = vperm.slane %v2977_v44, 0 }
 0x144   : > { %v1474_v40 = vadd.f32 %v1451_v34, %v1307_v35 }
 0x151   : > { %v1594_v30 = vpop.f32.mrf.mxu0 }
 0x152   : > { %v1608_v37 = vpop.f32.mrf.mxu1 }
 0x153   : > { %v1618_v49 = vadd.f32 %v1608_v37, %v1473_v46  ;;  %v1472_v37 = vadd.f32 %v1449_v28, %v1305_v32 }
 0x155   : > { %v1636_v54 = vadd.f32 %v1632_v50, %v1618_v49  ;;  %v1617_v45 = vadd.f32 %v1594_v30, %v1472_v37 }
 0x159   : > { %v1596_v38 = vpop.f32.mrf.mxu0 }
 0x15a   : > { %v1610_v51 = vpop.f32.mrf.mxu1  ;;  %v1619_v46 = vadd.f32 %v1596_v38, %v1474_v40 }
 0x15b   : > { %v1620_v52 = vadd.f32 %v1610_v51, %v1475_v48  ;;  %v1635_v51 = vadd.f32 %v1631_v43, %v1617_v45 }
 0x15c   : > { %v1637_v44 = vadd.f32 %v1631_v43, %v1619_v46 }
 0x15d   : > { %v1638_v55 = vadd.f32 %v1632_v50, %v1620_v52 }
 0x15f   : > { %v1639_v56 = vmax.f32 %v1636_v54, %v1638_v55 }
 0x161   : > { %v1640_v58 = vrot.slane %v1639_v56, 4 }
 0x163   : > { %v1641_v59 = vmax.f32 %v1639_v56, %v1640_v58 }
 0x165   : > { %v1642_v60 = vrot.slane %v1641_v59, 2 }
 0x167   : > { %v1643_v62 = vmax.f32 %v1641_v59, %v1642_v60 }
 0x169   : > { %v1644_v63 = vrot.slane %v1643_v62, 1 }
 0x16b   : > { %v1645_v1 = vmax.f32 %v1643_v62, %v1644_v63 }
 0x16d   : > { %v1646_v2 = vsub.f32 %v1636_v54, %v1645_v1  ;;  %v1647_v3 = vsub.f32 %v1638_v55, %v1645_v1 }
 0x16f   : > { %v1648_v4 = vmul.f32 1.442695, %v1646_v2  ;;  %v1650_v5 = vmul.f32 1.442695, %v1647_v3 }
 0x171   : > { %2645 = vpow2.f32 %v1648_v4 }
 0x172   : > { %2647 = vpow2.f32 %v1650_v5 }
 0x177   : > { %v2646_v8 = vpop.eup %2645 }
 0x178   : > { %v2648_v9 = vpop.eup %2647 }
 0x179   : > { %v1652_v11 = vadd.f32 %v2648_v9, %v2646_v8 }
 0x17b   : > { %v1653_v13 = vrot.slane %v1652_v11, 4 }
 0x17d   : > { %v1654_v16 = vadd.f32 %v1653_v13, %v1652_v11 }
 0x17f   : > { %v1655_v18 = vrot.slane %v1654_v16, 2 }
 0x181   : > { %v1656_v22 = vadd.f32 %v1655_v18, %v1654_v16 }
 0x183   : > { %v1657_v23 = vrot.slane %v1656_v22, 1 }
 0x185   : > { %v1658_v29 = vadd.f32 %v1657_v23, %v1656_v22 }
 0x187   : > { %2649 = vrcp.f32 %v1658_v29  ;;  %v1670_v39 = vand.u32 2147483648, %v1658_v29  ;;  %v1668_v42 = vand.u32 2147483647, %v1658_v29  ;;  %vm1664_vm8 = vweird.f32 %v1658_v29 }
 0x189   : > { %v1671_v48 = vor.u32 1.1754944e-38, %v1670_v39  ;;  %vm1669_vm10 = vcmp.eq.f32.partialorder %v1668_v42, 8.507059e+37 }
 0x18d   : > { %v2650_v24 = vpop.eup %2649 }
 0x18e   : > { %v1660_v33 = vmul.f32 %v2650_v24, %v1658_v29  ;;  %vm1665_vm7 = vweird.f32 %v2650_v24 }
 0x18f   : > { %vm1666_vm9 = vmor %vm1664_vm8, %vm1665_vm7 }
 0x190   : > { %v1661_v36 = vsub.f32 1.0, %v1660_v33 }
 0x192   : > { %v1662_v41 = vmul.f32 %v2650_v24, %v1661_v36 }
 0x194   : > { %v1663_v47 = vadd.f32 %v2650_v24, %v1662_v41 }
 0x196   : > { %v1667_v49 = vsel %vm1666_vm9, %v2650_v24, %v1663_v47 }
 0x197   : > { %v1672_v50 = vsel %vm1669_vm10, %v1671_v48, %v1667_v49 }
 0x198   : > { %v1674_v52 = vmul.f32 %v2646_v8, %v1672_v50  ;;  %v1675_v53 = vmul.f32 %v2648_v9, %v1672_v50 }
 0x19a   : > { %v1676_v54 = vmul.f32 %v1674_v52, %v1635_v51  ;;  %v1677_v55 = vmul.f32 %v1675_v53, %v1637_v44 }
 0x19c   : > { %1678 = vst [vmem:[%s221_s16] sm:$0xff] %v1676_v54 }
 0x19d   : > { %1679 = vst [vmem:[%s221_s16 + $0x8] sm:$0xff] %v1677_v55 }
 0x19e   : > { %2768 = shalt.err (!%p2765_p10)
}
 0x19f   : > { %s2819_s24 = smov 128   ;;  %s2820_s26 = smov 8  }
 0x1a0   : > { %2582 = dma.vmem_to_hbm [thread:$0]  (%p2907_p3), %s1694_s29, 256, %s1696_s4, %s1681_s5, %s2819_s24, %s2819_s24, %s2820_s26  }
 0x1a1 PF: > { %s1710_s30 = sand.u32 1, %s2799_s12   ;;  %p3024_p12 = scmp.ge.s32.totalorder %s2811_s15, 2 }
 0x1a2   : > { %s1711_s18 = scalar_lea.sflag [#allocation5], %s1710_s30 }
 0x1a3   : > { %p2596_p13 = pnand %p3024_p12, %p2876_p6 }
 0x1a5   : > { %p2597_p0 = pneg %p2596_p13 }
 0x1a7   : > { %2794 = dma.done.wait (%p2597_p0), %s1711_s18, 256  }
 0x1a8   : > { %2796 = vsyncadd (%p2597_p0), %s1711_s18, 4294967040  ;;  %p17_p5 = scmp.ge.s32.totalorder %s2897_s6, 4   ;;  %s3025_s12 = smov %s2803_s13 }
 0x1a9   : > { %s3026_s13 = smov %s2807_s14  ;;  %s3027_s14 = smov %s2913_s10 }
 0x1aa   : > { %s3028_s15 = smov %s2897_s6  ;;  %19 = sbr.rel (!%p17_p5) target bundleno = 6 (0x6), region = 93 }
 0x1af   :  { %1717 = vsyncpa [#allocation4], 1 }
 0x1b0   :  { %1719 = vsyncpa [#allocation4 + $0x1], 1 }
 0x1b1   :  { %1720 = vsyncpa [#allocation7], 1 }
 0x1b2   :  { %1721 = vsyncpa [#allocation5], 1 }
 0x1b3   :  { %1723 = vsyncpa [#allocation5 + $0x1], 1 }

</bundles_post_ra>
